<compile_context>
chip_gen: v7x
topology: tpu7x:2x2x1
jax: 0.10.0
libtpu: 0.0.40
codegen_flags: <defaults>
</compile_context>

<pallas_src>
import jax
import jax.numpy as jnp
from jax.experimental import pallas as pl
from jax.experimental.pallas import tpu as pltpu


# ------------------------------ helpers ------------------------------------ #

def _round_up(x, m):
    return pl.cdiv(x, m) * m


def _pad2d(x, rows, cols):
    r, c = x.shape
    if r == rows and c == cols:
        return x            # no-op for tile-aligned shapes (the common case)
    return jnp.pad(x, ((0, rows - r), (0, cols - c)))


def _vmem_capacity_bytes():
    try:
        return int(pltpu.get_tpu_info().vmem_capacity_bytes)
    except Exception:
        return 64 * 1024 * 1024   # conservative fallback: v7x per-TC VMEM


# ----------------------------- fused kernel -------------------------------- #

def _fused_hgnn_kernel(adj_ref, emb_ref, o_ref, lat_ref):
    """Fused HGNN propagation.

    adj_ref : (tm, Hp)  node-row tile of the incidence matrix
    emb_ref : (tm, Lp)  node-row tile of the embeddings (phase 0 only)
    o_ref   : (tm, Lp)  output tile (written in phase 1 only)
    lat_ref : (Hp, Lp)  f32 VMEM scratch holding lat = adj.T @ embeds,
                        resident across the whole grid.
    """
    phase = pl.program_id(0)
    tile = pl.program_id(1)

    @pl.when((phase == 0) & (tile == 0))
    def _init():
        lat_ref[...] = jnp.zeros_like(lat_ref)

    @pl.when(phase == 0)
    def _accumulate_lat():
        # Contract over the node rows (dim 0 of both tiles) directly — no
        # materialized transpose, result accumulated in f32.
        lat_ref[...] += jax.lax.dot_general(
            adj_ref[...], emb_ref[...],
            dimension_numbers=(((0,), (0,)), ((), ())),
            preferred_element_type=jnp.float32)

    @pl.when(phase == 1)
    def _emit_output():
        # Full-K product against the resident lat: no K grid axis, no extra
        # accumulator, lane-dense (multiple-of-128) output store.
        o_ref[...] = jnp.dot(
            adj_ref[...], lat_ref[...].astype(adj_ref.dtype),
            preferred_element_type=jnp.float32).astype(o_ref.dtype)


# ------------------------------- wrapper ------------------------------------ #

def hgnn_layer_forward(adj, embeds, *, tm=512, compute_dtype=None):
    """HGNNLayer.forward: adj @ (adj.T @ embeds), fused in one pallas_call."""
    n_nodes, n_hyper = adj.shape
    n_nodes_e, latdim = embeds.shape
    assert n_nodes == n_nodes_e, (adj.shape, embeds.shape)

    out_dtype = embeds.dtype
    if compute_dtype is not None:
        adj = adj.astype(compute_dtype)
        embeds = embeds.astype(compute_dtype)

    hp = _round_up(n_hyper, 128)          # lane dim of adj tiles / rows of lat
    lp = _round_up(latdim, 128)           # lane-dense feature dim
    tm = max(8, min(tm, _round_up(n_nodes, 8)))
    tm = _round_up(tm, 8)
    mp = _round_up(n_nodes, tm)
    n_tiles = mp // tm

    # Zero padding is exact for these matmuls and a no-op when already aligned.
    adj_p = _pad2d(adj, mp, hp)
    emb_p = _pad2d(embeds, mp, lp)

    in_itm = adj_p.dtype.itemsize
    out_itm = out_dtype.itemsize
    vmem_need = (hp * lp * 4                 # resident f32 lat scratch
                 + 2 * tm * hp * in_itm      # double-buffered adj tiles
                 + 2 * tm * lp * in_itm      # double-buffered embeds tiles
                 + 2 * tm * lp * out_itm)    # double-buffered output tiles
    cap = _vmem_capacity_bytes()
    vmem_limit = min(int(cap * 3 // 4), max(2 * vmem_need, 32 * 1024 * 1024))
    if vmem_need > vmem_limit:
        # TODO(synk): add a streaming (K-tiled, two-call) fallback for problem
        # sizes whose hyperedge panel / lat no longer fit in VMEM.
        raise ValueError(
            f"fused HGNN working set {vmem_need} B exceeds VMEM budget "
            f"{vmem_limit} B; reduce tm or use a streaming variant")

    grid = (2, n_tiles)
    adj_spec = pl.BlockSpec((tm, hp), lambda p, i: (i, 0))
    # embeds is only read in phase 0; during phase 1 its block index is pinned
    # to the last phase-0 block so no extra DMA is issued.
    emb_spec = pl.BlockSpec(
        (tm, lp), lambda p, i: (i * (1 - p) + (n_tiles - 1) * p, 0))
    # output is only written in phase 1; during phase 0 its index is pinned to
    # block 0 so the (not yet written) VMEM buffer is never flushed early.
    out_spec = pl.BlockSpec((tm, lp), lambda p, i: (i * p, 0))

    out = pl.pallas_call(
        _fused_hgnn_kernel,
        out_shape=jax.ShapeDtypeStruct((mp, lp), out_dtype),
        grid_spec=pltpu.PrefetchScalarGridSpec(
            num_scalar_prefetch=0,
            grid=grid,
            in_specs=[adj_spec, emb_spec],
            out_specs=out_spec,
            scratch_shapes=[pltpu.VMEM((hp, lp), jnp.float32)]),
        compiler_params=pltpu.CompilerParams(
            # lat carries across both grid axes -> sequential execution.
            # TODO(synk): a megacore (2-TC) split of the phase-1 row tiles
            # would need a core_map / two-call variant; not worth it at these
            # working-set sizes where launch overhead dominates.
            dimension_semantics=("arbitrary", "arbitrary"),
            vmem_limit_bytes=int(vmem_limit)),
    )(adj_p, emb_p)

    if (mp, lp) != (n_nodes, latdim):
        out = out[:n_nodes, :latdim]
    return out


# --------------------------------- main ------------------------------------- #

if __name__ == "__main__":
    # Small, tile-aligned shapes: nodes x hyperedges incidence matrix plus node
    # embeddings with a lane-dense (multiple of 128) latent dimension.
    n_nodes, n_hyperedges, latdim = 512, 256, 128

    key = jax.random.PRNGKey(0)
    k_adj, k_emb = jax.random.split(key)
    adj = jax.random.uniform(k_adj, (n_nodes, n_hyperedges), jnp.float32)
    embeds = jax.random.normal(k_emb, (n_nodes, latdim), jnp.float32)

    # f32 path (default): matches the PyTorch forward numerics closely.
    out = jax.block_until_ready(hgnn_layer_forward(adj, embeds))

    # Pure-JAX reference (highest precision).
    lat_ref = jnp.dot(adj.T, embeds, precision=jax.lax.Precision.HIGHEST)
    ref = jnp.dot(adj, lat_ref, precision=jax.lax.Precision.HIGHEST)
    assert out.shape == ref.shape == (n_nodes, latdim)
    rel_err = jnp.max(jnp.abs(out - ref)) / (jnp.max(jnp.abs(ref)) + 1e-6)
    assert float(rel_err) < 1e-3, f"relative error too large: {float(rel_err)}"

    # bf16-input path (halves adj HBM traffic, f32 accumulation) — looser tol.
    out_bf16 = jax.block_until_ready(
        hgnn_layer_forward(adj, embeds, compute_dtype=jnp.bfloat16))
    rel_err_bf16 = (jnp.max(jnp.abs(out_bf16 - ref))
                    / (jnp.max(jnp.abs(ref)) + 1e-6))
    assert float(rel_err_bf16) < 3e-2, (
        f"bf16 relative error too large: {float(rel_err_bf16)}")

    # NOTE: HGNNLayer.__init__ builds nn.LeakyReLU but forward() never applies
    # it, so no activation is emitted (matches the reference semantics).
    print("KERNEL_OK")
</pallas_src>

<mosaic_0001>
module attributes {stable_mosaic.version = 11 : i64} {
  func.func @_fused_hgnn_kernel(%arg0: i32, %arg1: i32, %arg2: memref<512x256xf32, #tpu.memory_space<vmem>>, %arg3: memref<512x128xf32, #tpu.memory_space<vmem>>, %arg4: memref<512x128xf32, #tpu.memory_space<vmem>>, %arg5: memref<256x128xf32, #tpu.memory_space<vmem>>) attributes {dimension_semantics = [#tpu.dimension_semantics<arbitrary>, #tpu.dimension_semantics<arbitrary>], iteration_bounds = array<i64: 2, 1>, scalar_prefetch = 0 : i64, scratch_operands = 1 : i64, tpu.core_type = #tpu.core_type<tc>, window_params = [{transform_indices = @transform_0, window_bounds = array<i64: 512, 256>}, {transform_indices = @transform_1, window_bounds = array<i64: 512, 128>}, {transform_indices = @transform_2, window_bounds = array<i64: 512, 128>}]} {
    %c0_i32 = arith.constant 0 : i32
    %0 = arith.cmpi eq, %arg0, %c0_i32 : i32
    %c0_i32_0 = arith.constant 0 : i32
    %1 = arith.cmpi eq, %arg1, %c0_i32_0 : i32
    %2 = arith.andi %0, %1 : i1
    %3 = arith.extui %2 : i1 to i32
    %c0_i32_1 = arith.constant 0 : i32
    %4 = arith.cmpi ne, %3, %c0_i32_1 : i32
    scf.if %4 {
      %cst = arith.constant 0.000000e+00 : f32
      %11 = vector.broadcast %cst : f32 to vector<256x128xf32>
      %c0 = arith.constant 0 : index
      %c0_5 = arith.constant 0 : index
      %12 = vector.load %arg5[%c0, %c0_5] : memref<256x128xf32, #tpu.memory_space<vmem>>, vector<256x128xf32>
      tpu.vector_store %arg5[%c0, %c0_5], %11 {strides = array<i32>} : memref<256x128xf32, #tpu.memory_space<vmem>>, vector<256x128xf32>,
    } else {
    }
    %c0_i32_2 = arith.constant 0 : i32
    %5 = arith.cmpi eq, %arg0, %c0_i32_2 : i32
    %6 = arith.extui %5 : i1 to i32
    %c0_i32_3 = arith.constant 0 : i32
    %7 = arith.cmpi ne, %6, %c0_i32_3 : i32
    scf.if %7 {
      %c0 = arith.constant 0 : index
      %c0_5 = arith.constant 0 : index
      %11 = vector.load %arg5[%c0, %c0_5] : memref<256x128xf32, #tpu.memory_space<vmem>>, vector<256x128xf32>
      %c0_6 = arith.constant 0 : index
      %c0_7 = arith.constant 0 : index
      %12 = vector.load %arg2[%c0_6, %c0_7] : memref<512x256xf32, #tpu.memory_space<vmem>>, vector<512x256xf32>
      %c0_8 = arith.constant 0 : index
      %c0_9 = arith.constant 0 : index
      %13 = vector.load %arg3[%c0_8, %c0_9] : memref<512x128xf32, #tpu.memory_space<vmem>>, vector<512x128xf32>
      %cst = arith.constant dense<0.000000e+00> : vector<256x128xf32>
      %14 = tpu.matmul %12, %13, %cst {dimension_numbers = #tpu.dot_dimension_numbers<[0], [0], [1], [1], [0, 1, 1, 1], [], []>} : vector<512x256xf32>, vector<512x128xf32>, vector<256x128xf32> -> vector<256x128xf32>
      %15 = arith.addf %11, %14 : vector<256x128xf32>
      %c0_10 = arith.constant 0 : index
      %c0_11 = arith.constant 0 : index
      %16 = vector.load %arg5[%c0_10, %c0_11] : memref<256x128xf32, #tpu.memory_space<vmem>>, vector<256x128xf32>
      tpu.vector_store %arg5[%c0_10, %c0_11], %15 {strides = array<i32>} : memref<256x128xf32, #tpu.memory_space<vmem>>, vector<256x128xf32>,
    } else {
    }
    %c1_i32 = arith.constant 1 : i32
    %8 = arith.cmpi eq, %arg0, %c1_i32 : i32
    %9 = arith.extui %8 : i1 to i32
    %c0_i32_4 = arith.constant 0 : i32
    %10 = arith.cmpi ne, %9, %c0_i32_4 : i32
    scf.if %10 {
      %c0 = arith.constant 0 : index
      %c0_5 = arith.constant 0 : index
      %11 = vector.load %arg2[%c0, %c0_5] : memref<512x256xf32, #tpu.memory_space<vmem>>, vector<512x256xf32>
      %c0_6 = arith.constant 0 : index
      %c0_7 = arith.constant 0 : index
      %12 = vector.load %arg5[%c0_6, %c0_7] : memref<256x128xf32, #tpu.memory_space<vmem>>, vector<256x128xf32>
      %cst = arith.constant dense<0.000000e+00> : vector<512x128xf32>
      %13 = tpu.matmul %11, %12, %cst {dimension_numbers = #tpu.dot_dimension_numbers<[1], [0], [0], [1], [0, 0, 1, 1], [], []>} : vector<512x256xf32>, vector<256x128xf32>, vector<512x128xf32> -> vector<512x128xf32>
      %c0_8 = arith.constant 0 : index
      %c0_9 = arith.constant 0 : index
      %14 = vector.load %arg4[%c0_8, %c0_9] : memref<512x128xf32, #tpu.memory_space<vmem>>, vector<512x128xf32>
      tpu.vector_store %arg4[%c0_8, %c0_9], %13 {strides = array<i32>} : memref<512x128xf32, #tpu.memory_space<vmem>>, vector<512x128xf32>,
    } else {
    }
    return
  }
  func.func @transform_0(%arg0: i32, %arg1: i32) -> (i32, i32) {
    %c0_i32 = arith.constant 0 : i32
    %c0_i32_0 = arith.constant 0 : i32
    return %arg1, %c0_i32 : i32, i32
  }
  func.func @transform_1(%arg0: i32, %arg1: i32) -> (i32, i32) {
    %c1_i32 = arith.constant 1 : i32
    %0 = arith.subi %c1_i32, %arg0 : i32
    %1 = arith.muli %arg1, %0 : i32
    %c0_i32 = arith.constant 0 : i32
    %2 = arith.muli %c0_i32, %arg0 : i32
    %3 = arith.addi %1, %2 : i32
    %c0_i32_0 = arith.constant 0 : i32
    %c0_i32_1 = arith.constant 0 : i32
    return %3, %c0_i32_0 : i32, i32
  }
  func.func @transform_2(%arg0: i32, %arg1: i32) -> (i32, i32) {
    %0 = arith.muli %arg1, %arg0 : i32
    %c0_i32 = arith.constant 0 : i32
    %c0_i32_0 = arith.constant 0 : i32
    return %0, %c0_i32 : i32, i32
  }
}

</mosaic_0001>

<bundles_post_ra>
// kernel: tpu_custom_call.1
= control target key start
LH: loop header
LB: loop body
LE: loop exit
PB: predicated region body
PF: predicated region fallthrough
CT: control target
= control target key end

     0   :  { %7 = vsyncpa [#allocation4], 0  ;;  %s3021_s0 = inlined_call_operand.hbm [shape: f32[512,256], index: 0, kind: input, shape index: {}]   ;;  %s3022_s1 = inlined_call_operand.hbm [shape: f32[512,128], index: 1, kind: input, shape index: {}]   ;;  %s3023_s2 = inlined_call_operand.hbm [shape: f32[512,128], index: 2, kind: output, shape index: {}]  }
   0x1   :  { %8 = vsyncpa [#allocation7], 0 }
   0x2   :  { %10 = vsyncpa [#allocation7 + $0x1], 0 }
   0x3   :  { %11 = vsyncpa [#allocation5], 0 }
   0x4   :  { %13 = vsyncpa [#allocation5 + $0x1], 0  ;;  %s2824_s9 = smov 0   ;;  %s2826_s10 = smov 0  }
   0x5   :  { %s2828_s11 = smov 0  }
   0x6 LB: > { %s1970_s12 = sadd.s32 4294967295, %s2795_s11   ;;  %s1971_s13 = sadd.s32 4294967294, %s2795_s11   ;;  %s2795_s11 = sphi %s2828_s11, %s19_s11   ;;  %s2791_s10 = sphi %s2826_s10, %s3038_s10   ;;  %s2787_s9 = sphi %s2824_s9, %s3037_s9  }
   0x7   : > { %s31_s14 = sadd.s32 1, %s2791_s10  ;;  %p1972_p0 = scmp.ge.s32.totalorder %s2795_s11, 1 }
   0x8   : > { %p33_p1 = scmp.ge.s32.totalorder %s31_s14, 2  ;;  %p120_p2 = scmp.lt.s32.totalorder %s2795_s11, 3 }
   0x9   : > { %p2846_p3 = scmp.eq.s32.totalorder %s1970_s12, 0  ;;  %s2797_s17 = smov [#allocation3]  }
   0xa   : > { %s3040_s14 = smov (%p33_p1, %s31_s14), 0  ;;  %p2852_p4 = pnand %p1972_p0, %p120_p2 }
   0xb   : > { %s3027_s15 = scalar_select %p2846_p3, 1, 0 }
   0xc   : > { %s3028_s16 = scalar_select %p2852_p4, 1, 0 }
   0xd   : > { %s136_s18 = sshll.u32 %s2797_s17, 4  ;;  %p2175_p5 = pneg %p2852_p4  ;;  %s137_s18 = int_to_ptr.vmem [resolvable:$true] %s136_s18 }
   0xe   : > { %s2679_s22 = scalar_lea.hbm %s3021_s0, 16384 }
   0xf   : > { %p2861_p7 = pnand %p2846_p3, %p2175_p5  ;;  %p2680_p10 = scmp.ne.s32.totalorder %s3021_s0, %s2679_s22 }
  0x10   : > { %p2686_p0 = scmp.lt.u32.totalorder %s2679_s22, %s3021_s0 }
  0x11   : > { %p2681_p11 = pneg %p2861_p7 }
  0x13   : > { %p2682_p12 = pnand %p2681_p11, %p2680_p10 }
  0x15   : > { %p2683_p13 = pneg %p2682_p12 }
  0x17   : > { %p2688_p1 = pnand %p2686_p0, %p2683_p13 }
  0x19   : > { %2691 = shalt.err (!%p2688_p1)
}
  0x1a   : > { %s2692_s27 = scalar_lea.vmem %s137_s18, 16384  ;;  %p2700_p9 = scmp.lt.s32.totalorder %s137_s18, %s137_s18 }
  0x1b   : > { %p2693_p2 = scmp.ne.s32.totalorder %s137_s18, %s2692_s27  ;;  %p2701_p8 = scmp.lt.s32.totalorder %s2692_s27, %s2692_s27 }
  0x1d   : > { %p2695_p5 = pnand %p2693_p2, %p2681_p11  ;;  %p2702_p3 = por %p2701_p8, %p2700_p9 }
  0x1f   : > { %p2696_p6 = pneg %p2695_p5 }
  0x21   : > { %p2703_p4 = pnand %p2702_p3, %p2696_p6 }
  0x23   : > { %2706 = shalt.err (!%p2703_p4)
}
  0x24   : > { %s2798_s28 = smov 256   ;;  %s2799_s29 = smov 16  }
  0x25   : > { %2178 = dma.hbm_to_vmem [thread:$0]  (!%p2861_p7), %s3021_s0, 16384, %s137_s18, [#allocation4], %s2798_s28, %s2798_s28, %s2799_s29  }
  0x26   : > { %s2800_s4 = smov [#allocation6]   ;;  %p3030_p10 = scmp.lt.s32.totalorder %s2795_s11, 2 }
  0x27   : > { %s163_s5 = sshll.u32 %s2800_s4, 4  ;;  %p3031_p11 = scmp.eq.s32.totalorder %s2795_s11, 0  ;;  %s164_s5 = int_to_ptr.vmem [resolvable:$true] %s163_s5 }
  0x28   : > { %s2707_s17 = scalar_lea.hbm %s3022_s1, 8192 }
  0x29   : > { %p2887_p12 = pnand %p3031_p11, %p3030_p10  ;;  %p2708_p3 = scmp.ne.s32.totalorder %s3022_s1, %s2707_s17 }
  0x2a   : > { %p2714_p8 = scmp.lt.u32.totalorder %s2707_s17, %s3022_s1 }
  0x2b   : > { %p2709_p4 = pneg %p2887_p12 }
  0x2d   : > { %p2710_p6 = pnand %p2709_p4, %p2708_p3 }
  0x2f   : > { %p2711_p7 = pneg %p2710_p6 }
  0x31   : > { %p2716_p9 = pnand %p2714_p8, %p2711_p7 }
  0x33   : > { %2719 = shalt.err (!%p2716_p9)
}
  0x34   : > { %s2720_s22 = scalar_lea.vmem %s164_s5, 8192  ;;  %s2727_s23 = scalar_lea.vmem %s164_s5, 16384 }
  0x35   : > { %p2721_p13 = scmp.ne.s32.totalorder %s164_s5, %s2720_s22  ;;  %p2728_p2 = scmp.lt.s32.totalorder %s164_s5, %s164_s5 }
  0x36   : > { %p2729_p5 = scmp.lt.s32.totalorder %s2727_s23, %s2720_s22 }
  0x37   : > { %p2723_p0 = pnand %p2721_p13, %p2709_p4 }
  0x38   : > { %p2730_p10 = por %p2729_p5, %p2728_p2 }
  0x39   : > { %p2724_p1 = pneg %p2723_p0 }
  0x3b   : > { %p2731_p11 = pnand %p2730_p10, %p2724_p1 }
  0x3d   : > { %2734 = shalt.err (!%p2731_p11)
}
  0x3e   : > { %s2801_s24 = smov 128   ;;  %s2802_s25 = smov 8  }
  0x3f   : > { %2182 = dma.hbm_to_vmem [thread:$0]  (!%p2887_p12), %s3022_s1, 8192, %s164_s5, [#allocation7], %s2801_s24, %s2801_s24, %s2802_s25  }
  0x40   : > { %p3033_p3 = scmp.ne.s32.totalorder %s3028_s16, 0 }
  0x41   : > { %p3034_p4 = scmp.ne.s32.totalorder (!%p3033_p3), %s3027_s15, 0 }
  0x42   : > { %175 = sbr.rel (%p3033_p3) target bundleno = 1001 (0x3e9), region = 28 }
  0x49   : > { %2774 = dma.done.wait (%p3034_p4), [#allocation4], 16384  }
  0x4a   : > { %2776 = vsyncadd (%p3034_p4), [#allocation4], 4294950912 }
  0x4b   : > { %2778 = dma.done.wait (%p3034_p4), [#allocation7], 8192  }
  0x4c   : > { %2780 = vsyncadd (%p3034_p4), [#allocation7], 4294959104  ;;  %p212_p6 = scmp.eq.s32.totalorder %s2787_s9, 0 }
  0x4d   : > { %v2803_v0 = vmov (%p212_p6), 0.0  }
  0x4e   : > { %217 = sbr.rel (!%p212_p6) target bundleno = 94 (0x5e), region = 40  ;;  %218 = vst [vmem:[#allocation2] sm:$0xff] (%p212_p6), %v2803_v0  ;;  %219 = vst [vmem:[#allocation2 + $0x8] sm:$0xff] (%p212_p6), %v2803_v0 }
  0x4f   : > { %220 = vst [vmem:[#allocation2 + $0x10] sm:$0xff] (%p212_p6), %v2803_v0  ;;  %221 = vst [vmem:[#allocation2 + $0x18] sm:$0xff] (%p212_p6), %v2803_v0 }
  0x50   : > { %222 = vst [vmem:[#allocation2 + $0x20] sm:$0xff] (%p212_p6), %v2803_v0  ;;  %223 = vst [vmem:[#allocation2 + $0x28] sm:$0xff] (%p212_p6), %v2803_v0 }
  0x51   : > { %224 = vst [vmem:[#allocation2 + $0x30] sm:$0xff] (%p212_p6), %v2803_v0  ;;  %225 = vst [vmem:[#allocation2 + $0x38] sm:$0xff] (%p212_p6), %v2803_v0 }
  0x52   : > { %226 = vst [vmem:[#allocation2 + $0x40] sm:$0xff] (%p212_p6), %v2803_v0  ;;  %227 = vst [vmem:[#allocation2 + $0x48] sm:$0xff] (%p212_p6), %v2803_v0 }
  0x53   : > { %228 = vst [vmem:[#allocation2 + $0x50] sm:$0xff] (%p212_p6), %v2803_v0  ;;  %229 = vst [vmem:[#allocation2 + $0x58] sm:$0xff] (%p212_p6), %v2803_v0 }
  0x54   : > { %230 = vst [vmem:[#allocation2 + $0x60] sm:$0xff] (%p212_p6), %v2803_v0  ;;  %231 = vst [vmem:[#allocation2 + $0x68] sm:$0xff] (%p212_p6), %v2803_v0 }
  0x55   : > { %232 = vst [vmem:[#allocation2 + $0x70] sm:$0xff] %v2803_v0  ;;  %233 = vst [vmem:[#allocation2 + $0x78] sm:$0xff] %v2803_v0 }
  0x56   : > { %234 = vst [vmem:[#allocation2 + $0x80] sm:$0xff] %v2803_v0  ;;  %235 = vst [vmem:[#allocation2 + $0x88] sm:$0xff] %v2803_v0 }
  0x57   : > { %236 = vst [vmem:[#allocation2 + $0x90] sm:$0xff] %v2803_v0  ;;  %237 = vst [vmem:[#allocation2 + $0x98] sm:$0xff] %v2803_v0 }
  0x58   : > { %238 = vst [vmem:[#allocation2 + $0xa0] sm:$0xff] %v2803_v0  ;;  %239 = vst [vmem:[#allocation2 + $0xa8] sm:$0xff] %v2803_v0 }
  0x59   : > { %240 = vst [vmem:[#allocation2 + $0xb0] sm:$0xff] %v2803_v0  ;;  %241 = vst [vmem:[#allocation2 + $0xb8] sm:$0xff] %v2803_v0 }
  0x5a   : > { %242 = vst [vmem:[#allocation2 + $0xc0] sm:$0xff] %v2803_v0  ;;  %243 = vst [vmem:[#allocation2 + $0xc8] sm:$0xff] %v2803_v0 }
  0x5b   : > { %244 = vst [vmem:[#allocation2 + $0xd0] sm:$0xff] %v2803_v0  ;;  %245 = vst [vmem:[#allocation2 + $0xd8] sm:$0xff] %v2803_v0 }
  0x5c   : > { %246 = vst [vmem:[#allocation2 + $0xe0] sm:$0xff] %v2803_v0  ;;  %247 = vst [vmem:[#allocation2 + $0xe8] sm:$0xff] %v2803_v0 }
  0x5d   : > { %248 = vst [vmem:[#allocation2 + $0xf0] sm:$0xff] %v2803_v0  ;;  %249 = vst [vmem:[#allocation2 + $0xf8] sm:$0xff] %v2803_v0 }
  0x5e PF: > { %p1980_p12 = scmp.ne.s32.totalorder %s2787_s9, 0 }
  0x5f   : > { %v317_v1 = vld [vmem:[#allocation3 + $0x100] sm:$0xff] (!%p1980_p12)  ;;  %v319_v6 = vld [vmem:[#allocation3 + $0x110] sm:$0xff] (!%p1980_p12)  ;;  %v2804_v8 = vmov (!%p1980_p12), 0.0|0.0   ;;  %v414_v45 = vld [vmem:[#allocation6 + $0x8] sm:$0xff] (!%p1980_p12) }
  0x60   : > { %252 = sbr.rel (%p1980_p12) target bundleno = 573 (0x23d), region = 44  ;;  %v381_v2 = vld [vmem:[#allocation3 + $0x300] sm:$0xff] (!%p1980_p12)  ;;  %v383_v7 = vld [vmem:[#allocation3 + $0x310] sm:$0xff] (!%p1980_p12)  ;;  %1987 = vmatprep.subr.bf16.mxu0 (!%p1980_p12), %v2804_v8  ;;  %2035 = vmatprep.subr.bf16.mxu1 (!%p1980_p12), %v2804_v8  ;;  %v446_v50 = vld [vmem:[#allocation6 + $0x108] sm:$0xff] (!%p1980_p12) }
  0x61   : > { %v285_v3 = vld [vmem:[#allocation3] sm:$0xff] (!%p1980_p12)  ;;  %v2231_v4 = vpack.i.bf16 (!%p1980_p12), %v381_v2, %v317_v1  ;;  %v287_v10 = vld [vmem:[#allocation3 + $0x10] sm:$0xff] (!%p1980_p12)  ;;  %v2233_v12 = vpack.i.bf16 (!%p1980_p12), %v383_v7, %v319_v6  ;;  %v416_v55 = vld [vmem:[#allocation6 + $0x18] sm:$0xff] (!%p1980_p12) }
  0x62   : > { %v349_v5 = vld [vmem:[#allocation3 + $0x200] sm:$0xff] (!%p1980_p12)  ;;  %v351_v11 = vld [vmem:[#allocation3 + $0x210] sm:$0xff] (!%p1980_p12)  ;;  %v448_v61 = vld [vmem:[#allocation6 + $0x118] sm:$0xff] (!%p1980_p12) }
  0x63   : > { %v2343_v9 = vpack.i.bf16 (!%p1980_p12), %v349_v5, %v285_v3  ;;  %2232 = vxpose.xlu0.b32.start [1/16] (!%p1980_p12), %v2231_v4, 128  ;;  %v2345_v13 = vpack.i.bf16 (!%p1980_p12), %v351_v11, %v287_v10  ;;  %v321_v14 = vld [vmem:[#allocation3 + $0x120] sm:$0xff] (!%p1980_p12)  ;;  %v323_v20 = vld [vmem:[#allocation3 + $0x130] sm:$0xff] (!%p1980_p12)  ;;  %v418_v3 = vld [vmem:[#allocation6 + $0x28] sm:$0xff] (!%p1980_p12) }
  0x64   : > { %v385_v15 = vld [vmem:[#allocation3 + $0x320] sm:$0xff] (!%p1980_p12)  ;;  %v387_v21 = vld [vmem:[#allocation3 + $0x330] sm:$0xff] (!%p1980_p12)  ;;  %v450_v5 = vld [vmem:[#allocation6 + $0x128] sm:$0xff] (!%p1980_p12) }
  0x65   : > { %2344 = vxpose.xlu1.b32.start [1/16] (!%p1980_p12), %v2343_v9, 128  ;;  %v289_v16 = vld [vmem:[#allocation3 + $0x20] sm:$0xff] (!%p1980_p12)  ;;  %v2235_v18 = vpack.i.bf16 (!%p1980_p12), %v385_v15, %v321_v14  ;;  %v291_v22 = vld [vmem:[#allocation3 + $0x30] sm:$0xff] (!%p1980_p12)  ;;  %v2237_v24 = vpack.i.bf16 (!%p1980_p12), %v387_v21, %v323_v20 }
  0x66   : > { %v353_v17 = vld [vmem:[#allocation3 + $0x220] sm:$0xff] (!%p1980_p12)  ;;  %v355_v23 = vld [vmem:[#allocation3 + $0x230] sm:$0xff] (!%p1980_p12) }
  0x67   : > { %2234 = vxpose.xlu0.b32.cont [2/16] %v2233_v12, 128  ;;  %v2347_v19 = vpack.i.bf16 %v353_v17, %v289_v16  ;;  %v2349_v25 = vpack.i.bf16 %v355_v23, %v291_v22  ;;  %v325_v26 = vld [vmem:[#allocation3 + $0x140] sm:$0xff]  ;;  %v327_v32 = vld [vmem:[#allocation3 + $0x150] sm:$0xff]  ;;  %v420_v12 = vld [vmem:[#allocation6 + $0x38] sm:$0xff] }
  0x68   : > { %v389_v27 = vld [vmem:[#allocation3 + $0x340] sm:$0xff]  ;;  %v391_v33 = vld [vmem:[#allocation3 + $0x350] sm:$0xff]  ;;  %v452_v16 = vld [vmem:[#allocation6 + $0x138] sm:$0xff] }
  0x69   : > { %2346 = vxpose.xlu1.b32.cont [2/16] %v2345_v13, 128  ;;  %v293_v28 = vld [vmem:[#allocation3 + $0x40] sm:$0xff]  ;;  %v2239_v30 = vpack.i.bf16 %v389_v27, %v325_v26  ;;  %v295_v34 = vld [vmem:[#allocation3 + $0x50] sm:$0xff]  ;;  %v2241_v36 = vpack.i.bf16 %v391_v33, %v327_v32 }
  0x6a   : > { %v357_v29 = vld [vmem:[#allocation3 + $0x240] sm:$0xff]  ;;  %v359_v35 = vld [vmem:[#allocation3 + $0x250] sm:$0xff] }
  0x6b   : > { %2236 = vxpose.xlu0.b32.cont [3/16] %v2235_v18, 128  ;;  %v2351_v31 = vpack.i.bf16 %v357_v29, %v293_v28  ;;  %v2353_v37 = vpack.i.bf16 %v359_v35, %v295_v34  ;;  %v329_v38 = vld [vmem:[#allocation3 + $0x160] sm:$0xff]  ;;  %v331_v43 = vld [vmem:[#allocation3 + $0x170] sm:$0xff]  ;;  %v454_v28 = vld [vmem:[#allocation6 + $0x148] sm:$0xff] }
  0x6c   : > { %v393_v39 = vld [vmem:[#allocation3 + $0x360] sm:$0xff]  ;;  %v395_v47 = vld [vmem:[#allocation3 + $0x370] sm:$0xff] }
  0x6d   : > { %2348 = vxpose.xlu1.b32.cont [3/16] %v2347_v19, 128  ;;  %v297_v40 = vld [vmem:[#allocation3 + $0x60] sm:$0xff]  ;;  %v2243_v42 = vpack.i.bf16 %v393_v39, %v329_v38  ;;  %v299_v51 = vld [vmem:[#allocation3 + $0x70] sm:$0xff]  ;;  %v2245_v57 = vpack.i.bf16 %v395_v47, %v331_v43 }
  0x6e   : > { %v361_v41 = vld [vmem:[#allocation3 + $0x260] sm:$0xff]  ;;  %v363_v52 = vld [vmem:[#allocation3 + $0x270] sm:$0xff] }
  0x6f   : > { %2238 = vxpose.xlu0.b32.cont [4/16] %v2237_v24, 128  ;;  %v413_v44 = vld [vmem:[#allocation6] sm:$0xff]  ;;  %v2355_v46 = vpack.i.bf16 %v361_v41, %v297_v40  ;;  %v415_v54 = vld [vmem:[#allocation6 + $0x10] sm:$0xff]  ;;  %v2357_v62 = vpack.i.bf16 %v363_v52, %v299_v51  ;;  %v422_v24 = vld [vmem:[#allocation6 + $0x48] sm:$0xff] }
  0x70   : > { %v1988_v48 = vpack.c.bf16 %v414_v45, %v413_v44  ;;  %v445_v49 = vld [vmem:[#allocation6 + $0x100] sm:$0xff]  ;;  %v447_v56 = vld [vmem:[#allocation6 + $0x110] sm:$0xff]  ;;  %v1991_v60 = vpack.c.bf16 %v416_v55, %v415_v54  ;;  %v456_v40 = vld [vmem:[#allocation6 + $0x158] sm:$0xff] }
  0x71   : > { %2350 = vxpose.xlu1.b32.cont [4/16] %v2349_v25, 128  ;;  %v2036_v53 = vpack.c.bf16 %v446_v50, %v445_v49  ;;  %v333_v58 = vld [vmem:[#allocation3 + $0x180] sm:$0xff]  ;;  %v2039_v1 = vpack.c.bf16 %v448_v61, %v447_v56  ;;  %v335_v9 = vld [vmem:[#allocation3 + $0x190] sm:$0xff]  ;;  %v458_v52 = vld [vmem:[#allocation6 + $0x168] sm:$0xff] }
  0x72   : > { %1989 = vmatpush1.bf16.msra.mxu0 %v1988_v48  ;;  %v397_v59 = vld [vmem:[#allocation3 + $0x380] sm:$0xff]  ;;  %v419_v11 = vld [vmem:[#allocation6 + $0x30] sm:$0xff]  ;;  %v426_v48 = vld [vmem:[#allocation6 + $0x68] sm:$0xff] }
  0x73   : > { %2240 = vxpose.xlu0.b32.cont [5/16] %v2239_v30, 128  ;;  %2037 = vmatpush1.bf16.msra.mxu1 %v2036_v53  ;;  %v301_v63 = vld [vmem:[#allocation3 + $0x80] sm:$0xff]  ;;  %v2247_v7 = vpack.i.bf16 %v397_v59, %v333_v58  ;;  %v399_v14 = vld [vmem:[#allocation3 + $0x390] sm:$0xff]  ;;  %v1997_v19 = vpack.c.bf16 %v420_v12, %v419_v11 }
  0x74   : > { %v365_v0 = vld [vmem:[#allocation3 + $0x280] sm:$0xff]  ;;  %1990 = vmatprep.subr.bf16.mxu0 %v2804_v8  ;;  %2038 = vmatprep.subr.bf16.mxu1 %v2804_v8  ;;  %v451_v15 = vld [vmem:[#allocation6 + $0x130] sm:$0xff]  ;;  %v2249_v20 = vpack.i.bf16 %v399_v14, %v335_v9  ;;  %v430_v9 = vld [vmem:[#allocation6 + $0x88] sm:$0xff] }
  0x75   : > { %2352 = vxpose.xlu1.b32.cont [5/16] %v2351_v31, 128  ;;  %v417_v2 = vld [vmem:[#allocation6 + $0x20] sm:$0xff]  ;;  %v2359_v13 = vpack.i.bf16 %v365_v0, %v301_v63  ;;  %v303_v17 = vld [vmem:[#allocation3 + $0x90] sm:$0xff]  ;;  %v2045_v22 = vpack.c.bf16 %v452_v16, %v451_v15  ;;  %v460_v0 = vld [vmem:[#allocation6 + $0x178] sm:$0xff] }
  0x76   : > { %v449_v4 = vld [vmem:[#allocation6 + $0x120] sm:$0xff]  ;;  %1992 = vmatpush1.bf16.msra.mxu0 %v1991_v60  ;;  %v1994_v6 = vpack.c.bf16 %v418_v3, %v417_v2  ;;  %v367_v18 = vld [vmem:[#allocation3 + $0x290] sm:$0xff]  ;;  %v428_v60 = vld [vmem:[#allocation6 + $0x78] sm:$0xff] }
  0x77   : > { %2242 = vxpose.xlu0.b32.cont [6/16] %v2241_v36, 128  ;;  %2040 = vmatpush1.bf16.msra.mxu1 %v2039_v1  ;;  %v2042_v10 = vpack.c.bf16 %v450_v5, %v449_v4  ;;  %v337_v21 = vld [vmem:[#allocation3 + $0x1a0] sm:$0xff]  ;;  %v2361_v25 = vpack.i.bf16 %v367_v18, %v303_v17  ;;  %v339_v33 = vld [vmem:[#allocation3 + $0x1b0] sm:$0xff]  ;;  %v424_v36 = vld [vmem:[#allocation6 + $0x58] sm:$0xff] }
  0x78   : > { %1993 = vmatprep.subr.bf16.mxu0 %v2804_v8  ;;  %2041 = vmatprep.subr.bf16.mxu1 %v2804_v8  ;;  %v421_v23 = vld [vmem:[#allocation6 + $0x40] sm:$0xff]  ;;  %v423_v35 = vld [vmem:[#allocation6 + $0x50] sm:$0xff] }
  0x79   : > { %2354 = vxpose.xlu1.b32.cont [6/16] %v2353_v37, 128  ;;  %v401_v26 = vld [vmem:[#allocation3 + $0x3a0] sm:$0xff]  ;;  %v2000_v31 = vpack.c.bf16 %v422_v24, %v421_v23  ;;  %v403_v38 = vld [vmem:[#allocation3 + $0x3b0] sm:$0xff]  ;;  %v2003_v43 = vpack.c.bf16 %v424_v36, %v423_v35  ;;  %v382_v35 = vld [vmem:[#allocation3 + $0x308] sm:$0xff] }
  0x7a   : > { %1995 = vmatpush1.bf16.msra.mxu0 %v1994_v6  ;;  %v453_v27 = vld [vmem:[#allocation6 + $0x140] sm:$0xff]  ;;  %v2251_v32 = vpack.i.bf16 %v401_v26, %v337_v21  ;;  %v455_v39 = vld [vmem:[#allocation6 + $0x150] sm:$0xff]  ;;  %v2253_v44 = vpack.i.bf16 %v403_v38, %v339_v33  ;;  %v432_v21 = vld [vmem:[#allocation6 + $0x98] sm:$0xff] }
  0x7b   : > { %2244 = vxpose.xlu0.b32.cont [7/16] %v2243_v42, 128  ;;  %2043 = vmatpush1.bf16.msra.mxu1 %v2042_v10  ;;  %v305_v29 = vld [vmem:[#allocation3 + $0xa0] sm:$0xff]  ;;  %v2048_v34 = vpack.c.bf16 %v454_v28, %v453_v27  ;;  %v307_v41 = vld [vmem:[#allocation3 + $0xb0] sm:$0xff]  ;;  %v434_v33 = vld [vmem:[#allocation6 + $0xa8] sm:$0xff] }
  0x7c   : > { %1996 = vmatprep.subr.bf16.mxu0 %v2804_v8  ;;  %v369_v30 = vld [vmem:[#allocation3 + $0x2a0] sm:$0xff]  ;;  %2044 = vmatprep.subr.bf16.mxu1 %v2804_v8  ;;  %v371_v42 = vld [vmem:[#allocation3 + $0x2b0] sm:$0xff]  ;;  %v286_v38 = vld [vmem:[#allocation3 + $0x8] sm:$0xff] }
  0x7d   : > { %2356 = vxpose.xlu1.b32.cont [7/16] %v2355_v46, 128  ;;  %v2363_v37 = vpack.i.bf16 %v369_v30, %v305_v29  ;;  %v341_v45 = vld [vmem:[#allocation3 + $0x1c0] sm:$0xff]  ;;  %v2051_v46 = vpack.c.bf16 %v456_v40, %v455_v39  ;;  %v2365_v49 = vpack.i.bf16 %v371_v42, %v307_v41  ;;  %v427_v59 = vld [vmem:[#allocation6 + $0x70] sm:$0xff]  ;;  %v318_v30 = vld [vmem:[#allocation3 + $0x108] sm:$0xff] }
  0x7e   : > { %1998 = vmatpush1.bf16.msra.mxu0 %v1997_v19  ;;  %v425_v47 = vld [vmem:[#allocation6 + $0x60] sm:$0xff]  ;;  %v459_v63 = vld [vmem:[#allocation6 + $0x170] sm:$0xff]  ;;  %v2009_v3 = vpack.c.bf16 %v428_v60, %v427_v59  ;;  %v350_v39 = vld [vmem:[#allocation3 + $0x208] sm:$0xff]  ;;  %v2455_v41 = vpack.i.bf16 %v382_v35, %v318_v30 }
  0x7f   : > { %2246 = vxpose.xlu0.b32.cont [8/16] %v2245_v57, 128  ;;  %2046 = vmatpush1.bf16.msra.mxu1 %v2045_v22  ;;  %v405_v50 = vld [vmem:[#allocation3 + $0x3c0] sm:$0xff]  ;;  %v2006_v55 = vpack.c.bf16 %v426_v48, %v425_v47  ;;  %v343_v57 = vld [vmem:[#allocation3 + $0x1d0] sm:$0xff]  ;;  %v2057_v6 = vpack.c.bf16 %v460_v0, %v459_v63  ;;  %v320_v42 = vld [vmem:[#allocation3 + $0x118] sm:$0xff] }
  0x80   : > { %1999 = vmatprep.subr.bf16.mxu0 %v2804_v8  ;;  %2047 = vmatprep.subr.bf16.mxu1 %v2804_v8  ;;  %v457_v51 = vld [vmem:[#allocation6 + $0x160] sm:$0xff]  ;;  %v2255_v56 = vpack.i.bf16 %v405_v50, %v341_v45  ;;  %v311_v1 = vld [vmem:[#allocation3 + $0xd0] sm:$0xff]  ;;  %v436_v45 = vld [vmem:[#allocation6 + $0xb8] sm:$0xff] }
  0x81   : > { %2358 = vxpose.xlu1.b32.cont [8/16] %v2357_v62, 128  ;;  %v309_v53 = vld [vmem:[#allocation3 + $0xc0] sm:$0xff]  ;;  %v2054_v58 = vpack.c.bf16 %v458_v52, %v457_v51  ;;  %v407_v62 = vld [vmem:[#allocation3 + $0x3d0] sm:$0xff]  ;;  %v384_v47 = vld [vmem:[#allocation3 + $0x318] sm:$0xff] }
  0x82   : > { %2001 = vmatpush1.bf16.msra.mxu0 %v2000_v31  ;;  %v373_v54 = vld [vmem:[#allocation3 + $0x2c0] sm:$0xff]  ;;  %v375_v2 = vld [vmem:[#allocation3 + $0x2d0] sm:$0xff]  ;;  %v2257_v4 = vpack.i.bf16 %v407_v62, %v343_v57  ;;  %v288_v50 = vld [vmem:[#allocation3 + $0x18] sm:$0xff] }
  0x83   : > { %2248 = vxpose.xlu0.b32.cont [9/16] %v2247_v7, 128  ;;  %2049 = vmatpush1.bf16.msra.mxu1 %v2048_v34  ;;  %v2367_v61 = vpack.i.bf16 %v373_v54, %v309_v53  ;;  %v345_v5 = vld [vmem:[#allocation3 + $0x1e0] sm:$0xff]  ;;  %v2369_v10 = vpack.i.bf16 %v375_v2, %v311_v1  ;;  %v347_v18 = vld [vmem:[#allocation3 + $0x1f0] sm:$0xff]  ;;  %v352_v51 = vld [vmem:[#allocation3 + $0x218] sm:$0xff]  ;;  %v2457_v53 = vpack.i.bf16 %v384_v47, %v320_v42 }
  0x84   : > { %2002 = vmatprep.subr.bf16.mxu0 %v2804_v8  ;;  %2050 = vmatprep.subr.bf16.mxu1 %v2804_v8  ;;  %v429_v7 = vld [vmem:[#allocation6 + $0x80] sm:$0xff]  ;;  %v411_v23 = vld [vmem:[#allocation3 + $0x3f0] sm:$0xff]  ;;  %v322_v54 = vld [vmem:[#allocation3 + $0x128] sm:$0xff] }
  0x85   : > { %2360 = vxpose.xlu1.b32.cont [9/16] %v2359_v13, 128  ;;  %v409_v11 = vld [vmem:[#allocation3 + $0x3e0] sm:$0xff]  ;;  %v462_v13 = vld [vmem:[#allocation6 + $0x188] sm:$0xff]  ;;  %v2012_v16 = vpack.c.bf16 %v430_v9, %v429_v7  ;;  %v463_v24 = vld [vmem:[#allocation6 + $0x190] sm:$0xff]  ;;  %v2261_v29 = vpack.i.bf16 %v411_v23, %v347_v18 }
  0x86   : > { %2004 = vmatpush1.bf16.msra.mxu0 %v2003_v43  ;;  %v461_v12 = vld [vmem:[#allocation6 + $0x180] sm:$0xff]  ;;  %v2259_v17 = vpack.i.bf16 %v409_v11, %v345_v5  ;;  %v315_v26 = vld [vmem:[#allocation3 + $0xf0] sm:$0xff]  ;;  %v438_v57 = vld [vmem:[#allocation6 + $0xc8] sm:$0xff] }
  0x87   : > { %2250 = vxpose.xlu0.b32.cont [10/16] %v2249_v20, 128  ;;  %2052 = vmatpush1.bf16.msra.mxu1 %v2051_v46  ;;  %v313_v14 = vld [vmem:[#allocation3 + $0xe0] sm:$0xff]  ;;  %v2060_v19 = vpack.c.bf16 %v462_v13, %v461_v12  ;;  %v431_v20 = vld [vmem:[#allocation6 + $0x90] sm:$0xff]  ;;  %v2567_v46 = vpack.i.bf16 %v350_v39, %v286_v38  ;;  %v386_v59 = vld [vmem:[#allocation3 + $0x328] sm:$0xff] }
  0x88   : > { %2005 = vmatprep.subr.bf16.mxu0 %v2804_v8  ;;  %2053 = vmatprep.subr.bf16.mxu1 %v2804_v8  ;;  %v377_v15 = vld [vmem:[#allocation3 + $0x2e0] sm:$0xff]  ;;  %v379_v27 = vld [vmem:[#allocation3 + $0x2f0] sm:$0xff]  ;;  %v2015_v28 = vpack.c.bf16 %v432_v21, %v431_v20  ;;  %v290_v62 = vld [vmem:[#allocation3 + $0x28] sm:$0xff]  ;;  %v2459_v1 = vpack.i.bf16 %v386_v59, %v322_v54 }
  0x89   : > { %2362 = vxpose.xlu1.b32.cont [10/16] %v2361_v25, 128  ;;  %v2371_v22 = vpack.i.bf16 %v377_v15, %v313_v14  ;;  %v464_v25 = vld [vmem:[#allocation6 + $0x198] sm:$0xff]  ;;  %v2373_v34 = vpack.i.bf16 %v379_v27, %v315_v26  ;;  %v465_v36 = vld [vmem:[#allocation6 + $0x1a0] sm:$0xff]  ;;  %v467_v48 = vld [vmem:[#allocation6 + $0x1b0] sm:$0xff] }
  0x8a   : > { %2007 = vmatpush1.bf16.msra.mxu0 %v2006_v55  ;;  %v2063_v31 = vpack.c.bf16 %v464_v25, %v463_v24  ;;  %v469_v60 = vld [vmem:[#allocation6 + $0x1c0] sm:$0xff]  ;;  %v354_v63 = vld [vmem:[#allocation3 + $0x228] sm:$0xff]  ;;  %v324_v2 = vld [vmem:[#allocation3 + $0x138] sm:$0xff] }
  0x8b   : > { %2252 = vxpose.xlu0.b32.cont [11/16] %v2251_v32, 128  ;;  %2055 = vmatpush1.bf16.msra.mxu1 %v2054_v58  ;;  %v433_v32 = vld [vmem:[#allocation6 + $0xa0] sm:$0xff]  ;;  %v2569_v58 = vpack.i.bf16 %v352_v51, %v288_v50  ;;  %v440_v5 = vld [vmem:[#allocation6 + $0xd8] sm:$0xff]  ;;  %v471_v9 = vld [vmem:[#allocation6 + $0x1d0] sm:$0xff] }
  0x8c   : > { %2008 = vmatprep.subr.bf16.mxu0 %v2804_v8  ;;  %2056 = vmatprep.subr.bf16.mxu1 %v2804_v8  ;;  %v2018_v40 = vpack.c.bf16 %v434_v33, %v433_v32  ;;  %v388_v7 = vld [vmem:[#allocation3 + $0x338] sm:$0xff]  ;;  %v326_v15 = vld [vmem:[#allocation3 + $0x148] sm:$0xff]  ;;  %v473_v21 = vld [vmem:[#allocation6 + $0x1e0] sm:$0xff] }
  0x8d   : > { %2364 = vxpose.xlu1.b32.cont [11/16] %v2363_v37, 128  ;;  %v466_v37 = vld [vmem:[#allocation6 + $0x1a8] sm:$0xff]  ;;  %v292_v11 = vld [vmem:[#allocation3 + $0x38] sm:$0xff]  ;;  %v2461_v14 = vpack.i.bf16 %v388_v7, %v324_v2  ;;  %v475_v33 = vld [vmem:[#allocation6 + $0x1f0] sm:$0xff] }
  0x8e   : > { %2010 = vmatpush1.bf16.msra.mxu0 %v2009_v3  ;;  %v2066_v43 = vpack.c.bf16 %v466_v37, %v465_v36  ;;  %v356_v12 = vld [vmem:[#allocation3 + $0x238] sm:$0xff]  ;;  %v442_v18 = vld [vmem:[#allocation6 + $0xe8] sm:$0xff] }
  0x8f   : > { %2254 = vxpose.xlu0.b32.cont [12/16] %v2253_v44, 128  ;;  %2058 = vmatpush1.bf16.msra.mxu1 %v2057_v6  ;;  %v435_v44 = vld [vmem:[#allocation6 + $0xb0] sm:$0xff]  ;;  %v2571_v6 = vpack.i.bf16 %v354_v63, %v290_v62  ;;  %v390_v20 = vld [vmem:[#allocation3 + $0x348] sm:$0xff]  ;;  %v328_v27 = vld [vmem:[#allocation3 + $0x158] sm:$0xff] }
  0x90   : > { %2011 = vmatprep.subr.bf16.mxu0 %v2804_v8  ;;  %2059 = vmatprep.subr.bf16.mxu1 %v2804_v8  ;;  %v2021_v52 = vpack.c.bf16 %v436_v45, %v435_v44  ;;  %v294_v23 = vld [vmem:[#allocation3 + $0x48] sm:$0xff]  ;;  %v2463_v26 = vpack.i.bf16 %v390_v20, %v326_v15  ;;  %v444_v30 = vld [vmem:[#allocation6 + $0xf8] sm:$0xff] }
  0x91   : > { %2366 = vxpose.xlu1.b32.cont [12/16] %v2365_v49, 128  ;;  %v468_v49 = vld [vmem:[#allocation6 + $0x1b8] sm:$0xff]  ;;  %v358_v24 = vld [vmem:[#allocation3 + $0x248] sm:$0xff] }
  0x92   : > { %2013 = vmatpush1.bf16.msra.mxu0 %v2012_v16  ;;  %v2069_v55 = vpack.c.bf16 %v468_v49, %v467_v48  ;;  %v392_v32 = vld [vmem:[#allocation3 + $0x358] sm:$0xff]  ;;  %v394_v42 = vld [vmem:[#allocation3 + $0x368] sm:$0xff] }
  0x93   : > { %2256 = vxpose.xlu0.b32.cont [13/16] %v2255_v56, 128  ;;  %2061 = vmatpush1.bf16.msra.mxu1 %v2060_v19  ;;  %v437_v56 = vld [vmem:[#allocation6 + $0xc0] sm:$0xff]  ;;  %v2573_v19 = vpack.i.bf16 %v356_v12, %v292_v11  ;;  %v296_v35 = vld [vmem:[#allocation3 + $0x58] sm:$0xff]  ;;  %v2465_v38 = vpack.i.bf16 %v392_v32, %v328_v27  ;;  %v362_v44 = vld [vmem:[#allocation3 + $0x268] sm:$0xff] }
  0x94   : > { %2014 = vmatprep.subr.bf16.mxu0 %v2804_v8  ;;  %2062 = vmatprep.subr.bf16.mxu1 %v2804_v8  ;;  %v2024_v0 = vpack.c.bf16 %v438_v57, %v437_v56  ;;  %v360_v36 = vld [vmem:[#allocation3 + $0x258] sm:$0xff]  ;;  %v398_v54 = vld [vmem:[#allocation3 + $0x388] sm:$0xff] }
  0x95   : > { %2368 = vxpose.xlu1.b32.cont [13/16] %v2367_v61, 128  ;;  %v470_v61 = vld [vmem:[#allocation6 + $0x1c8] sm:$0xff]  ;;  %v332_v47 = vld [vmem:[#allocation3 + $0x178] sm:$0xff] }
  0x96   : > { %2016 = vmatpush1.bf16.msra.mxu0 %v2015_v28  ;;  %v2072_v3 = vpack.c.bf16 %v470_v61, %v469_v60  ;;  %v396_v48 = vld [vmem:[#allocation3 + $0x378] sm:$0xff]  ;;  %v366_v56 = vld [vmem:[#allocation3 + $0x288] sm:$0xff] }
  0x97   : > { %2258 = vxpose.xlu0.b32.cont [14/16] %v2257_v4, 128  ;;  %2064 = vmatpush1.bf16.msra.mxu1 %v2063_v31  ;;  %v439_v4 = vld [vmem:[#allocation6 + $0xd0] sm:$0xff]  ;;  %v2575_v31 = vpack.i.bf16 %v358_v24, %v294_v23  ;;  %v300_v49 = vld [vmem:[#allocation3 + $0x78] sm:$0xff]  ;;  %v2469_v51 = vpack.i.bf16 %v396_v48, %v332_v47  ;;  %v306_v2 = vld [vmem:[#allocation3 + $0xa8] sm:$0xff] }
  0x98   : > { %2017 = vmatprep.subr.bf16.mxu0 %v2804_v8  ;;  %2065 = vmatprep.subr.bf16.mxu1 %v2804_v8  ;;  %v2027_v13 = vpack.c.bf16 %v440_v5, %v439_v4  ;;  %v364_v50 = vld [vmem:[#allocation3 + $0x278] sm:$0xff]  ;;  %v310_v15 = vld [vmem:[#allocation3 + $0xc8] sm:$0xff] }
  0x99   : > { %2370 = vxpose.xlu1.b32.cont [14/16] %v2369_v10, 128  ;;  %v472_v10 = vld [vmem:[#allocation6 + $0x1d8] sm:$0xff]  ;;  %v314_v27 = vld [vmem:[#allocation3 + $0xe8] sm:$0xff] }
  0x9a   : > { %2019 = vmatpush1.bf16.msra.mxu0 %v2018_v40  ;;  %v2075_v16 = vpack.c.bf16 %v472_v10, %v471_v9  ;;  %v2577_v40 = vpack.i.bf16 %v360_v36, %v296_v35  ;;  %v400_v59 = vld [vmem:[#allocation3 + $0x398] sm:$0xff] }
  0x9b   : > { %2260 = vxpose.xlu0.b32.cont [15/16] %v2259_v17, 128  ;;  %2067 = vmatpush1.bf16.msra.mxu1 %v2066_v43  ;;  %v441_v17 = vld [vmem:[#allocation6 + $0xe0] sm:$0xff]  ;;  %v298_v43 = vld [vmem:[#allocation3 + $0x68] sm:$0xff]  ;;  %v304_v60 = vld [vmem:[#allocation3 + $0x98] sm:$0xff] }
  0x9c   : > { %2020 = vmatprep.subr.bf16.mxu0 %v2804_v8  ;;  %2068 = vmatprep.subr.bf16.mxu1 %v2804_v8  ;;  %v2030_v25 = vpack.c.bf16 %v442_v18, %v441_v17  ;;  %v368_v61 = vld [vmem:[#allocation3 + $0x298] sm:$0xff] }
  0x9d   : > { %2372 = vxpose.xlu1.b32.cont [15/16] %v2371_v22, 128  ;;  %v474_v22 = vld [vmem:[#allocation6 + $0x1e8] sm:$0xff]  ;;  %v2585_v63 = vpack.i.bf16 %v368_v61, %v304_v60  ;;  %v404_v7 = vld [vmem:[#allocation3 + $0x3b8] sm:$0xff] }
  0x9e   : > { %2022 = vmatpush1.bf16.msra.mxu0 %v2021_v52  ;;  %v2078_v28 = vpack.c.bf16 %v474_v22, %v473_v21  ;;  %v2581_v52 = vpack.i.bf16 %v364_v50, %v300_v49  ;;  %v308_v9 = vld [vmem:[#allocation3 + $0xb8] sm:$0xff] }
  0x9f   : > { %2262 = vxpose.xlu0.b32.end [16/16] %v2261_v29, 128  ;;  %2070 = vmatpush1.bf16.msra.mxu1 %v2069_v55  ;;  %v443_v29 = vld [vmem:[#allocation6 + $0xf0] sm:$0xff]  ;;  %v302_v55 = vld [vmem:[#allocation3 + $0x88] sm:$0xff]  ;;  %v372_v10 = vld [vmem:[#allocation3 + $0x2b8] sm:$0xff] }
  0xa0   : > { %2023 = vmatprep.subr.bf16.mxu0 %v2804_v8  ;;  %2071 = vmatprep.subr.bf16.mxu1 %v2804_v8  ;;  %v2033_v37 = vpack.c.bf16 %v444_v30, %v443_v29  ;;  %v2583_v57 = vpack.i.bf16 %v366_v56, %v302_v55  ;;  %v2589_v12 = vpack.i.bf16 %v372_v10, %v308_v9  ;;  %v408_v20 = vld [vmem:[#allocation3 + $0x3d8] sm:$0xff] }
  0xa1   : > { %2374 = vxpose.xlu1.b32.end [16/16] %v2373_v34, 128  ;;  %v476_v34 = vld [vmem:[#allocation6 + $0x1f8] sm:$0xff] }
  0xa2   : > { %2025 = vmatpush1.bf16.msra.mxu0 %v2024_v0  ;;  %v2081_v39 = vpack.c.bf16 %v476_v34, %v475_v33  ;;  %v338_v0 = vld [vmem:[#allocation3 + $0x1a8] sm:$0xff]  ;;  %v312_v21 = vld [vmem:[#allocation3 + $0xd8] sm:$0xff] }
  0xa3   : > { %2456 = vxpose.xlu0.b32.start [1/16] %v2455_v41, 128  ;;  %2073 = vmatpush1.bf16.msra.mxu1 %v2072_v3  ;;  %v330_v41 = vld [vmem:[#allocation3 + $0x168] sm:$0xff]  ;;  %v376_v22 = vld [vmem:[#allocation3 + $0x2d8] sm:$0xff] }
  0xa4   : > { %2026 = vmatprep.subr.bf16.mxu0 %v2804_v8  ;;  %2074 = vmatprep.subr.bf16.mxu1 %v2804_v8  ;;  %v2467_v45 = vpack.i.bf16 %v394_v42, %v330_v41  ;;  %v370_v3 = vld [vmem:[#allocation3 + $0x2a8] sm:$0xff]  ;;  %v2593_v24 = vpack.i.bf16 %v376_v22, %v312_v21  ;;  %v412_v32 = vld [vmem:[#allocation3 + $0x3f8] sm:$0xff] }
  0xa5   : > { %2568 = vxpose.xlu1.b32.start [1/16] %v2567_v46, 128  ;;  %v2579_v46 = vpack.i.bf16 %v362_v44, %v298_v43  ;;  %v2587_v5 = vpack.i.bf16 %v370_v3, %v306_v2  ;;  %v316_v33 = vld [vmem:[#allocation3 + $0xf8] sm:$0xff] }
  0xa6   : > { %2028 = vmatpush1.bf16.msra.mxu0 %v2027_v13  ;;  %v342_v13 = vld [vmem:[#allocation3 + $0x1c8] sm:$0xff]  ;;  %v380_v34 = vld [vmem:[#allocation3 + $0x2f8] sm:$0xff] }
  0xa7   : > { %2458 = vxpose.xlu0.b32.cont [2/16] %v2457_v53, 128  ;;  %2076 = vmatpush1.bf16.msra.mxu1 %v2075_v16  ;;  %v334_v53 = vld [vmem:[#allocation3 + $0x188] sm:$0xff]  ;;  %v2597_v36 = vpack.i.bf16 %v380_v34, %v316_v33 }
  0xa8   : > { %2029 = vmatprep.subr.bf16.mxu0 %v2804_v8  ;;  %2077 = vmatprep.subr.bf16.mxu1 %v2804_v8  ;;  %v374_v16 = vld [vmem:[#allocation3 + $0x2c8] sm:$0xff] }
  0xa9   : > { %2570 = vxpose.xlu1.b32.cont [2/16] %v2569_v58, 128  ;;  %v336_v58 = vld [vmem:[#allocation3 + $0x198] sm:$0xff]  ;;  %v2591_v18 = vpack.i.bf16 %v374_v16, %v310_v15 }
  0xaa   : > { %2031 = vmatpush1.bf16.msra.mxu0 %v2030_v25  ;;  %v2473_v62 = vpack.i.bf16 %v400_v59, %v336_v58  ;;  %v346_v25 = vld [vmem:[#allocation3 + $0x1e8] sm:$0xff] }
  0xab   : > { %2460 = vxpose.xlu0.b32.cont [3/16] %v2459_v1, 128  ;;  %2079 = vmatpush1.bf16.msra.mxu1 %v2078_v28  ;;  %v402_v1 = vld [vmem:[#allocation3 + $0x3a8] sm:$0xff] }
  0xac   : > { %2032 = vmatprep.subr.bf16.mxu0 %v2804_v8  ;;  %2080 = vmatprep.subr.bf16.mxu1 %v2804_v8  ;;  %v2471_v8 = vpack.i.bf16 %v398_v54, %v334_v53  ;;  %v2475_v4 = vpack.i.bf16 %v402_v1, %v338_v0  ;;  %v378_v28 = vld [vmem:[#allocation3 + $0x2e8] sm:$0xff] }
  0xad   : > { %2572 = vxpose.xlu1.b32.cont [3/16] %v2571_v6, 128  ;;  %v340_v6 = vld [vmem:[#allocation3 + $0x1b8] sm:$0xff]  ;;  %v2595_v30 = vpack.i.bf16 %v378_v28, %v314_v27 }
  0xae   : > { %2034 = vmatpush1.bf16.msra.mxu0 %v2033_v37  ;;  %v2477_v11 = vpack.i.bf16 %v404_v7, %v340_v6 }
  0xaf   : > { %2462 = vxpose.xlu0.b32.cont [4/16] %v2461_v14, 128  ;;  %2082 = vmatpush1.bf16.msra.mxu1 %v2081_v39  ;;  %v406_v14 = vld [vmem:[#allocation3 + $0x3c8] sm:$0xff] }
  0xb0   : > { %v2479_v17 = vpack.i.bf16 %v406_v14, %v342_v13 }
  0xb1   : > { %2574 = vxpose.xlu1.b32.cont [4/16] %v2573_v19, 128  ;;  %v344_v19 = vld [vmem:[#allocation3 + $0x1d8] sm:$0xff] }
  0xb2   : > { %v2481_v23 = vpack.i.bf16 %v408_v20, %v344_v19 }
  0xb3   : > { %2464 = vxpose.xlu0.b32.cont [5/16] %v2463_v26, 128  ;;  %v410_v26 = vld [vmem:[#allocation3 + $0x3e8] sm:$0xff] }
  0xb4   : > { %v2483_v29 = vpack.i.bf16 %v410_v26, %v346_v25 }
  0xb5   : > { %2576 = vxpose.xlu1.b32.cont [5/16] %v2575_v31, 128  ;;  %v348_v31 = vld [vmem:[#allocation3 + $0x1f8] sm:$0xff] }
  0xb6   : > { %v2485_v35 = vpack.i.bf16 %v412_v32, %v348_v31 }
  0xb7   : > { %2466 = vxpose.xlu0.b32.cont [6/16] %v2465_v38, 128 }
  0xb9   : > { %2578 = vxpose.xlu1.b32.cont [6/16] %v2577_v40, 128 }
  0xbb   : > { %2468 = vxpose.xlu0.b32.cont [7/16] %v2467_v45, 128 }
  0xbd   : > { %2580 = vxpose.xlu1.b32.cont [7/16] %v2579_v46, 128 }
  0xbf   : > { %2470 = vxpose.xlu0.b32.cont [8/16] %v2469_v51, 128 }
  0xc1   : > { %2582 = vxpose.xlu1.b32.cont [8/16] %v2581_v52, 128 }
  0xc3   : > { %2472 = vxpose.xlu0.b32.cont [9/16] %v2471_v8, 128 }
  0xc5   : > { %2584 = vxpose.xlu1.b32.cont [9/16] %v2583_v57, 128 }
  0xc7   : > { %2474 = vxpose.xlu0.b32.cont [10/16] %v2473_v62, 128 }
  0xc9   : > { %2586 = vxpose.xlu1.b32.cont [10/16] %v2585_v63, 128 }
  0xcb   : > { %2476 = vxpose.xlu0.b32.cont [11/16] %v2475_v4, 128 }
  0xcd   : > { %2588 = vxpose.xlu1.b32.cont [11/16] %v2587_v5, 128 }
  0xcf   : > { %2478 = vxpose.xlu0.b32.cont [12/16] %v2477_v11, 128 }
  0xd1   : > { %2590 = vxpose.xlu1.b32.cont [12/16] %v2589_v12, 128 }
  0xd3   : > { %2480 = vxpose.xlu0.b32.cont [13/16] %v2479_v17, 128 }
  0xd5   : > { %2592 = vxpose.xlu1.b32.cont [13/16] %v2591_v18, 128 }
  0xd7   : > { %2482 = vxpose.xlu0.b32.cont [14/16] %v2481_v23, 128 }
  0xd9   : > { %2594 = vxpose.xlu1.b32.cont [14/16] %v2593_v24, 128 }
  0xdb   : > { %2484 = vxpose.xlu0.b32.cont [15/16] %v2483_v29, 128 }
  0xdd   : > { %2596 = vxpose.xlu1.b32.cont [15/16] %v2595_v30, 128 }
  0xdf   : > { %2486 = vxpose.xlu0.b32.end [16/16] %v2485_v35, 128 }
  0xe1   : > { %2598 = vxpose.xlu1.b32.end [16/16] %v2597_v36, 128 }
  0xe3   : > { %v2263_v37 = vpop.trf.xlu0 }
  0xe4   : > { %v2264_v39 = vunpack.i.l.bf16 %v2263_v37  ;;  %v2267_v40 = vunpack.i.h.bf16 %v2263_v37 }
  0xe5   : > { %v2375_v38 = vpop.trf.xlu1 }
  0xe6   : > { %v2376_v41 = vunpack.i.l.bf16 %v2375_v38  ;;  %v2379_v42 = vunpack.i.h.bf16 %v2375_v38  ;;  %797 = vmatprep.mubr.f32.mxu0 %v2264_v39  ;;  %1022 = vmatprep.mubr.f32.mxu1 %v2267_v40 }
  0xe7   : > { %v2268_v43 = vpop.trf.xlu0 }
  0xe8   : > { %798 = vmatmul.mubr.f32.vlgmr.msra.gmra.mrb[0].mxu0 %v2376_v41  ;;  %1023 = vmatmul.mubr.f32.vlgmr.msra.gmra.mrb[0].mxu1 %v2379_v42  ;;  %v2269_v45 = vunpack.i.l.bf16 %v2268_v43  ;;  %v2272_v46 = vunpack.i.h.bf16 %v2268_v43 }
  0xe9   : > { %v2380_v44 = vpop.trf.xlu1 }
  0xea   : > { %v2381_v47 = vunpack.i.l.bf16 %v2380_v44  ;;  %v2384_v48 = vunpack.i.h.bf16 %v2380_v44  ;;  %802 = vmatprep.mubr.f32.mxu0 %v2269_v45  ;;  %1027 = vmatprep.mubr.f32.mxu1 %v2272_v46 }
  0xeb   : > { %v2273_v49 = vpop.trf.xlu0 }
  0xec   : > { %803 = vmatmul.mubr.f32.gmra.mrb[2].mxu0 %v2381_v47  ;;  %1028 = vmatmul.mubr.f32.gmra.mrb[2].mxu1 %v2384_v48  ;;  %v2274_v51 = vunpack.i.l.bf16 %v2273_v49  ;;  %v2277_v52 = vunpack.i.h.bf16 %v2273_v49 }
  0xed   : > { %v2385_v50 = vpop.trf.xlu1 }
  0xee   : > { %v2386_v53 = vunpack.i.l.bf16 %v2385_v50  ;;  %v2389_v54 = vunpack.i.h.bf16 %v2385_v50  ;;  %807 = vmatprep.mubr.f32.mxu0 %v2274_v51  ;;  %1032 = vmatprep.mubr.f32.mxu1 %v2277_v52 }
  0xef   : > { %v2278_v55 = vpop.trf.xlu0 }
  0xf0   : > { %808 = vmatmul.mubr.f32.gmra.mrb[4].mxu0 %v2386_v53  ;;  %1033 = vmatmul.mubr.f32.gmra.mrb[4].mxu1 %v2389_v54  ;;  %v2279_v8 = vunpack.i.l.bf16 %v2278_v55  ;;  %v2282_v57 = vunpack.i.h.bf16 %v2278_v55 }
  0xf1   : > { %v2390_v56 = vpop.trf.xlu1 }
  0xf2   : > { %v2391_v58 = vunpack.i.l.bf16 %v2390_v56  ;;  %v2394_v59 = vunpack.i.h.bf16 %v2390_v56  ;;  %812 = vmatprep.mubr.f32.mxu0 %v2279_v8  ;;  %1037 = vmatprep.mubr.f32.mxu1 %v2282_v57 }
  0xf3   : > { %v2283_v60 = vpop.trf.xlu0 }
  0xf4   : > { %813 = vmatmul.mubr.f32.gmra.mrb[6].mxu0 %v2391_v58  ;;  %1038 = vmatmul.mubr.f32.gmra.mrb[6].mxu1 %v2394_v59  ;;  %v2284_v62 = vunpack.i.l.bf16 %v2283_v60  ;;  %v2287_v63 = vunpack.i.h.bf16 %v2283_v60 }
  0xf5   : > { %v2395_v61 = vpop.trf.xlu1 }
  0xf6   : > { %v2396_v0 = vunpack.i.l.bf16 %v2395_v61  ;;  %v2399_v1 = vunpack.i.h.bf16 %v2395_v61  ;;  %817 = vmatprep.mubr.f32.mxu0 %v2284_v62  ;;  %1042 = vmatprep.mubr.f32.mxu1 %v2287_v63 }
  0xf7   : > { %v2288_v2 = vpop.trf.xlu0 }
  0xf8   : > { %818 = vmatmul.mubr.f32.gmra.mrb[8].mxu0 %v2396_v0  ;;  %1043 = vmatmul.mubr.f32.gmra.mrb[8].mxu1 %v2399_v1  ;;  %v2289_v4 = vunpack.i.l.bf16 %v2288_v2  ;;  %v2292_v5 = vunpack.i.h.bf16 %v2288_v2 }
  0xf9   : > { %v2400_v3 = vpop.trf.xlu1 }
  0xfa   : > { %v2401_v6 = vunpack.i.l.bf16 %v2400_v3  ;;  %v2404_v7 = vunpack.i.h.bf16 %v2400_v3  ;;  %822 = vmatprep.mubr.f32.mxu0 %v2289_v4  ;;  %1047 = vmatprep.mubr.f32.mxu1 %v2292_v5 }
  0xfb   : > { %v2293_v9 = vpop.trf.xlu0 }
  0xfc   : > { %823 = vmatmul.mubr.f32.gmra.mrb[10].mxu0 %v2401_v6  ;;  %1048 = vmatmul.mubr.f32.gmra.mrb[10].mxu1 %v2404_v7  ;;  %v2294_v11 = vunpack.i.l.bf16 %v2293_v9  ;;  %v2297_v12 = vunpack.i.h.bf16 %v2293_v9 }
  0xfd   : > { %v2405_v10 = vpop.trf.xlu1 }
  0xfe   : > { %v2406_v13 = vunpack.i.l.bf16 %v2405_v10  ;;  %v2409_v14 = vunpack.i.h.bf16 %v2405_v10  ;;  %827 = vmatprep.mubr.f32.mxu0 %v2294_v11  ;;  %1052 = vmatprep.mubr.f32.mxu1 %v2297_v12 }
  0xff   : > { %v2298_v15 = vpop.trf.xlu0 }
 0x100   : > { %828 = vmatmul.mubr.f32.gmra.mrb[12].mxu0 %v2406_v13  ;;  %1053 = vmatmul.mubr.f32.gmra.mrb[12].mxu1 %v2409_v14  ;;  %v2299_v17 = vunpack.i.l.bf16 %v2298_v15  ;;  %v2302_v18 = vunpack.i.h.bf16 %v2298_v15 }
 0x101   : > { %v2410_v16 = vpop.trf.xlu1 }
 0x102   : > { %v2411_v19 = vunpack.i.l.bf16 %v2410_v16  ;;  %v2414_v20 = vunpack.i.h.bf16 %v2410_v16  ;;  %832 = vmatprep.mubr.f32.mxu0 %v2299_v17  ;;  %1057 = vmatprep.mubr.f32.mxu1 %v2302_v18 }
 0x103   : > { %v2303_v21 = vpop.trf.xlu0 }
 0x104   : > { %833 = vmatmul.mubr.f32.gmra.mrb[14].mxu0 %v2411_v19  ;;  %1058 = vmatmul.mubr.f32.gmra.mrb[14].mxu1 %v2414_v20  ;;  %v2304_v23 = vunpack.i.l.bf16 %v2303_v21  ;;  %v2307_v24 = vunpack.i.h.bf16 %v2303_v21 }
 0x105   : > { %v2415_v22 = vpop.trf.xlu1 }
 0x106   : > { %v2416_v25 = vunpack.i.l.bf16 %v2415_v22  ;;  %v2419_v26 = vunpack.i.h.bf16 %v2415_v22  ;;  %837 = vmatprep.mubr.f32.mxu0 %v2304_v23  ;;  %1062 = vmatprep.mubr.f32.mxu1 %v2307_v24 }
 0x107   : > { %v2308_v27 = vpop.trf.xlu0 }
 0x108   : > { %838 = vmatmul.mubr.f32.gmra.mrb[16].mxu0 %v2416_v25  ;;  %1063 = vmatmul.mubr.f32.gmra.mrb[16].mxu1 %v2419_v26  ;;  %v2309_v29 = vunpack.i.l.bf16 %v2308_v27  ;;  %v2312_v30 = vunpack.i.h.bf16 %v2308_v27 }
 0x109   : > { %v2420_v28 = vpop.trf.xlu1 }
 0x10a   : > { %v2421_v31 = vunpack.i.l.bf16 %v2420_v28  ;;  %v2424_v32 = vunpack.i.h.bf16 %v2420_v28  ;;  %842 = vmatprep.mubr.f32.mxu0 %v2309_v29  ;;  %1067 = vmatprep.mubr.f32.mxu1 %v2312_v30 }
 0x10b   : > { %v2313_v33 = vpop.trf.xlu0 }
 0x10c   : > { %843 = vmatmul.mubr.f32.gmra.mrb[18].mxu0 %v2421_v31  ;;  %1068 = vmatmul.mubr.f32.gmra.mrb[18].mxu1 %v2424_v32  ;;  %v2314_v35 = vunpack.i.l.bf16 %v2313_v33  ;;  %v2317_v36 = vunpack.i.h.bf16 %v2313_v33 }
 0x10d   : > { %v2425_v34 = vpop.trf.xlu1 }
 0x10e   : > { %v2426_v37 = vunpack.i.l.bf16 %v2425_v34  ;;  %v2429_v38 = vunpack.i.h.bf16 %v2425_v34  ;;  %847 = vmatprep.mubr.f32.mxu0 %v2314_v35  ;;  %1072 = vmatprep.mubr.f32.mxu1 %v2317_v36 }
 0x10f   : > { %v2318_v39 = vpop.trf.xlu0 }
 0x110   : > { %848 = vmatmul.mubr.f32.gmra.mrb[20].mxu0 %v2426_v37  ;;  %1073 = vmatmul.mubr.f32.gmra.mrb[20].mxu1 %v2429_v38  ;;  %v2319_v41 = vunpack.i.l.bf16 %v2318_v39  ;;  %v2322_v42 = vunpack.i.h.bf16 %v2318_v39 }
 0x111   : > { %v2430_v40 = vpop.trf.xlu1 }
 0x112   : > { %v2431_v43 = vunpack.i.l.bf16 %v2430_v40  ;;  %v2434_v44 = vunpack.i.h.bf16 %v2430_v40  ;;  %852 = vmatprep.mubr.f32.mxu0 %v2319_v41  ;;  %1077 = vmatprep.mubr.f32.mxu1 %v2322_v42 }
 0x113   : > { %v2323_v45 = vpop.trf.xlu0 }
 0x114   : > { %853 = vmatmul.mubr.f32.gmra.mrb[22].mxu0 %v2431_v43  ;;  %1078 = vmatmul.mubr.f32.gmra.mrb[22].mxu1 %v2434_v44  ;;  %v2324_v47 = vunpack.i.l.bf16 %v2323_v45  ;;  %v2327_v48 = vunpack.i.h.bf16 %v2323_v45 }
 0x115   : > { %v2435_v46 = vpop.trf.xlu1 }
 0x116   : > { %v2436_v49 = vunpack.i.l.bf16 %v2435_v46  ;;  %v2439_v50 = vunpack.i.h.bf16 %v2435_v46  ;;  %857 = vmatprep.mubr.f32.mxu0 %v2324_v47  ;;  %1082 = vmatprep.mubr.f32.mxu1 %v2327_v48 }
 0x117   : > { %v2328_v51 = vpop.trf.xlu0 }
 0x118   : > { %858 = vmatmul.mubr.f32.gmra.mrb[24].mxu0 %v2436_v49  ;;  %1083 = vmatmul.mubr.f32.gmra.mrb[24].mxu1 %v2439_v50  ;;  %v2329_v53 = vunpack.i.l.bf16 %v2328_v51  ;;  %v2332_v54 = vunpack.i.h.bf16 %v2328_v51 }
 0x119   : > { %v2440_v52 = vpop.trf.xlu1 }
 0x11a   : > { %v2441_v55 = vunpack.i.l.bf16 %v2440_v52  ;;  %v2444_v56 = vunpack.i.h.bf16 %v2440_v52  ;;  %862 = vmatprep.mubr.f32.mxu0 %v2329_v53  ;;  %1087 = vmatprep.mubr.f32.mxu1 %v2332_v54 }
 0x11b   : > { %v2333_v8 = vpop.trf.xlu0 }
 0x11c   : > { %863 = vmatmul.mubr.f32.gmra.mrb[26].mxu0 %v2441_v55  ;;  %1088 = vmatmul.mubr.f32.gmra.mrb[26].mxu1 %v2444_v56  ;;  %v2334_v58 = vunpack.i.l.bf16 %v2333_v8  ;;  %v2337_v59 = vunpack.i.h.bf16 %v2333_v8 }
 0x11d   : > { %v2445_v57 = vpop.trf.xlu1 }
 0x11e   : > { %v2446_v60 = vunpack.i.l.bf16 %v2445_v57  ;;  %v2449_v61 = vunpack.i.h.bf16 %v2445_v57  ;;  %867 = vmatprep.mubr.f32.mxu0 %v2334_v58  ;;  %1092 = vmatprep.mubr.f32.mxu1 %v2337_v59 }
 0x11f   : > { %v2338_v62 = vpop.trf.xlu0 }
 0x120   : > { %868 = vmatmul.mubr.f32.gmra.mrb[28].mxu0 %v2446_v60  ;;  %1093 = vmatmul.mubr.f32.gmra.mrb[28].mxu1 %v2449_v61  ;;  %v2339_v0 = vunpack.i.l.bf16 %v2338_v62  ;;  %v2342_v1 = vunpack.i.h.bf16 %v2338_v62 }
 0x121   : > { %v2450_v63 = vpop.trf.xlu1 }
 0x122   : > { %v2451_v2 = vunpack.i.l.bf16 %v2450_v63  ;;  %v2454_v3 = vunpack.i.h.bf16 %v2450_v63  ;;  %872 = vmatprep.mubr.f32.mxu0 %v2339_v0  ;;  %1097 = vmatprep.mubr.f32.mxu1 %v2342_v1 }
 0x123   : > { %v2487_v4 = vpop.trf.xlu0 }
 0x124   : > { %873 = vmatmul.mubr.f32.gmra.mrb[30].mxu0 %v2451_v2  ;;  %1098 = vmatmul.mubr.f32.gmra.mrb[30].mxu1 %v2454_v3  ;;  %v2488_v6 = vunpack.i.l.bf16 %v2487_v4  ;;  %v2491_v7 = vunpack.i.h.bf16 %v2487_v4 }
 0x125   : > { %v2599_v5 = vpop.trf.xlu1 }
 0x126   : > { %v2600_v9 = vunpack.i.l.bf16 %v2599_v5  ;;  %v2603_v10 = vunpack.i.h.bf16 %v2599_v5  ;;  %877 = vmatprep.mubr.f32.mxu0 %v2488_v6  ;;  %1102 = vmatprep.mubr.f32.mxu1 %v2491_v7 }
 0x127   : > { %v2492_v11 = vpop.trf.xlu0 }
 0x128   : > { %878 = vmatmul.mubr.f32.gmra.mrb[32].mxu0 %v2600_v9  ;;  %1103 = vmatmul.mubr.f32.gmra.mrb[32].mxu1 %v2603_v10  ;;  %v2493_v13 = vunpack.i.l.bf16 %v2492_v11  ;;  %v2496_v14 = vunpack.i.h.bf16 %v2492_v11 }
 0x129   : > { %v2604_v12 = vpop.trf.xlu1 }
 0x12a   : > { %v2605_v15 = vunpack.i.l.bf16 %v2604_v12  ;;  %v2608_v16 = vunpack.i.h.bf16 %v2604_v12  ;;  %882 = vmatprep.mubr.f32.mxu0 %v2493_v13  ;;  %1107 = vmatprep.mubr.f32.mxu1 %v2496_v14 }
 0x12b   : > { %v2497_v17 = vpop.trf.xlu0 }
 0x12c   : > { %883 = vmatmul.mubr.f32.gmra.mrb[34].mxu0 %v2605_v15  ;;  %1108 = vmatmul.mubr.f32.gmra.mrb[34].mxu1 %v2608_v16  ;;  %v2498_v19 = vunpack.i.l.bf16 %v2497_v17  ;;  %v2501_v20 = vunpack.i.h.bf16 %v2497_v17 }
 0x12d   : > { %v2609_v18 = vpop.trf.xlu1 }
 0x12e   : > { %v2610_v21 = vunpack.i.l.bf16 %v2609_v18  ;;  %v2613_v22 = vunpack.i.h.bf16 %v2609_v18  ;;  %887 = vmatprep.mubr.f32.mxu0 %v2498_v19  ;;  %1112 = vmatprep.mubr.f32.mxu1 %v2501_v20 }
 0x12f   : > { %v2502_v23 = vpop.trf.xlu0 }
 0x130   : > { %888 = vmatmul.mubr.f32.gmra.mrb[36].mxu0 %v2610_v21  ;;  %1113 = vmatmul.mubr.f32.gmra.mrb[36].mxu1 %v2613_v22  ;;  %v2503_v25 = vunpack.i.l.bf16 %v2502_v23  ;;  %v2506_v26 = vunpack.i.h.bf16 %v2502_v23 }
 0x131   : > { %v2614_v24 = vpop.trf.xlu1 }
 0x132   : > { %v2615_v27 = vunpack.i.l.bf16 %v2614_v24  ;;  %v2618_v28 = vunpack.i.h.bf16 %v2614_v24  ;;  %892 = vmatprep.mubr.f32.mxu0 %v2503_v25  ;;  %1117 = vmatprep.mubr.f32.mxu1 %v2506_v26 }
 0x133   : > { %v2507_v29 = vpop.trf.xlu0 }
 0x134   : > { %893 = vmatmul.mubr.f32.gmra.mrb[38].mxu0 %v2615_v27  ;;  %1118 = vmatmul.mubr.f32.gmra.mrb[38].mxu1 %v2618_v28  ;;  %v2508_v31 = vunpack.i.l.bf16 %v2507_v29  ;;  %v2511_v32 = vunpack.i.h.bf16 %v2507_v29 }
 0x135   : > { %v2619_v30 = vpop.trf.xlu1 }
 0x136   : > { %v2620_v33 = vunpack.i.l.bf16 %v2619_v30  ;;  %v2623_v34 = vunpack.i.h.bf16 %v2619_v30  ;;  %897 = vmatprep.mubr.f32.mxu0 %v2508_v31  ;;  %1122 = vmatprep.mubr.f32.mxu1 %v2511_v32 }
 0x137   : > { %v2512_v35 = vpop.trf.xlu0 }
 0x138   : > { %898 = vmatmul.mubr.f32.gmra.mrb[40].mxu0 %v2620_v33  ;;  %1123 = vmatmul.mubr.f32.gmra.mrb[40].mxu1 %v2623_v34  ;;  %v2513_v37 = vunpack.i.l.bf16 %v2512_v35  ;;  %v2516_v38 = vunpack.i.h.bf16 %v2512_v35 }
 0x139   : > { %v2624_v36 = vpop.trf.xlu1 }
 0x13a   : > { %v2625_v39 = vunpack.i.l.bf16 %v2624_v36  ;;  %v2628_v40 = vunpack.i.h.bf16 %v2624_v36  ;;  %902 = vmatprep.mubr.f32.mxu0 %v2513_v37  ;;  %1127 = vmatprep.mubr.f32.mxu1 %v2516_v38  ;;  %v253_v38 = vld [vmem:[#allocation2] sm:$0xff] }
 0x13b   : > { %v2517_v41 = vpop.trf.xlu0 }
 0x13c   : > { %903 = vmatmul.mubr.f32.gmra.mrb[42].mxu0 %v2625_v39  ;;  %1128 = vmatmul.mubr.f32.gmra.mrb[42].mxu1 %v2628_v40  ;;  %v2518_v43 = vunpack.i.l.bf16 %v2517_v41  ;;  %v2521_v44 = vunpack.i.h.bf16 %v2517_v41 }
 0x13d   : > { %v2629_v42 = vpop.trf.xlu1 }
 0x13e   : > { %v2630_v45 = vunpack.i.l.bf16 %v2629_v42  ;;  %v2633_v46 = vunpack.i.h.bf16 %v2629_v42  ;;  %907 = vmatprep.mubr.f32.mxu0 %v2518_v43  ;;  %1132 = vmatprep.mubr.f32.mxu1 %v2521_v44 }
 0x13f   : > { %v2522_v47 = vpop.trf.xlu0 }
 0x140   : > { %908 = vmatmul.mubr.f32.gmra.mrb[44].mxu0 %v2630_v45  ;;  %1133 = vmatmul.mubr.f32.gmra.mrb[44].mxu1 %v2633_v46  ;;  %v2523_v49 = vunpack.i.l.bf16 %v2522_v47  ;;  %v2526_v50 = vunpack.i.h.bf16 %v2522_v47  ;;  %v254_v45 = vld [vmem:[#allocation2 + $0x8] sm:$0xff] }
 0x141   : > { %v2634_v48 = vpop.trf.xlu1 }
 0x142   : > { %v2635_v51 = vunpack.i.l.bf16 %v2634_v48  ;;  %v2638_v52 = vunpack.i.h.bf16 %v2634_v48  ;;  %912 = vmatprep.mubr.f32.mxu0 %v2523_v49  ;;  %1137 = vmatprep.mubr.f32.mxu1 %v2526_v50 }
 0x143   : > { %v2527_v53 = vpop.trf.xlu0 }
 0x144   : > { %913 = vmatmul.mubr.f32.gmra.mrb[46].mxu0 %v2635_v51  ;;  %1138 = vmatmul.mubr.f32.gmra.mrb[46].mxu1 %v2638_v52  ;;  %v2528_v55 = vunpack.i.l.bf16 %v2527_v53  ;;  %v2531_v56 = vunpack.i.h.bf16 %v2527_v53  ;;  %v255_v52 = vld [vmem:[#allocation2 + $0x10] sm:$0xff] }
 0x145   : > { %v2639_v54 = vpop.trf.xlu1 }
 0x146   : > { %v2640_v8 = vunpack.i.l.bf16 %v2639_v54  ;;  %v2643_v57 = vunpack.i.h.bf16 %v2639_v54  ;;  %917 = vmatprep.mubr.f32.mxu0 %v2528_v55  ;;  %1142 = vmatprep.mubr.f32.mxu1 %v2531_v56 }
 0x147   : > { %v2532_v58 = vpop.trf.xlu0 }
 0x148   : > { %918 = vmatmul.mubr.f32.gmra.mrb[48].mxu0 %v2640_v8  ;;  %1143 = vmatmul.mubr.f32.gmra.mrb[48].mxu1 %v2643_v57  ;;  %v2533_v60 = vunpack.i.l.bf16 %v2532_v58  ;;  %v2536_v61 = vunpack.i.h.bf16 %v2532_v58  ;;  %v256_v58 = vld [vmem:[#allocation2 + $0x18] sm:$0xff] }
 0x149   : > { %v2644_v59 = vpop.trf.xlu1 }
 0x14a   : > { %v2645_v62 = vunpack.i.l.bf16 %v2644_v59  ;;  %v2648_v63 = vunpack.i.h.bf16 %v2644_v59  ;;  %922 = vmatprep.mubr.f32.mxu0 %v2533_v60  ;;  %1147 = vmatprep.mubr.f32.mxu1 %v2536_v61 }
 0x14b   : > { %v2537_v0 = vpop.trf.xlu0 }
 0x14c   : > { %923 = vmatmul.mubr.f32.gmra.mrb[50].mxu0 %v2645_v62  ;;  %1148 = vmatmul.mubr.f32.gmra.mrb[50].mxu1 %v2648_v63  ;;  %v2538_v2 = vunpack.i.l.bf16 %v2537_v0  ;;  %v2541_v3 = vunpack.i.h.bf16 %v2537_v0 }
 0x14d   : > { %v2649_v1 = vpop.trf.xlu1 }
 0x14e   : > { %v2650_v4 = vunpack.i.l.bf16 %v2649_v1  ;;  %v2653_v5 = vunpack.i.h.bf16 %v2649_v1  ;;  %927 = vmatprep.mubr.f32.mxu0 %v2538_v2  ;;  %1152 = vmatprep.mubr.f32.mxu1 %v2541_v3  ;;  %v257_v1 = vld [vmem:[#allocation2 + $0x20] sm:$0xff] }
 0x14f   : > { %v2542_v6 = vpop.trf.xlu0 }
 0x150   : > { %928 = vmatmul.mubr.f32.gmra.mrb[52].mxu0 %v2650_v4  ;;  %1153 = vmatmul.mubr.f32.gmra.mrb[52].mxu1 %v2653_v5  ;;  %v2543_v9 = vunpack.i.l.bf16 %v2542_v6  ;;  %v2546_v10 = vunpack.i.h.bf16 %v2542_v6 }
 0x151   : > { %v2654_v7 = vpop.trf.xlu1 }
 0x152   : > { %v2655_v11 = vunpack.i.l.bf16 %v2654_v7  ;;  %v2658_v12 = vunpack.i.h.bf16 %v2654_v7  ;;  %932 = vmatprep.mubr.f32.mxu0 %v2543_v9  ;;  %1157 = vmatprep.mubr.f32.mxu1 %v2546_v10  ;;  %v258_v9 = vld [vmem:[#allocation2 + $0x28] sm:$0xff] }
 0x153   : > { %v2547_v13 = vpop.trf.xlu0 }
 0x154   : > { %933 = vmatmul.mubr.f32.gmra.mrb[54].mxu0 %v2655_v11  ;;  %1158 = vmatmul.mubr.f32.gmra.mrb[54].mxu1 %v2658_v12  ;;  %v2548_v15 = vunpack.i.l.bf16 %v2547_v13  ;;  %v2551_v16 = vunpack.i.h.bf16 %v2547_v13 }
 0x155   : > { %v2659_v14 = vpop.trf.xlu1 }
 0x156   : > { %v2660_v17 = vunpack.i.l.bf16 %v2659_v14  ;;  %v2663_v18 = vunpack.i.h.bf16 %v2659_v14  ;;  %937 = vmatprep.mubr.f32.mxu0 %v2548_v15  ;;  %1162 = vmatprep.mubr.f32.mxu1 %v2551_v16  ;;  %v259_v16 = vld [vmem:[#allocation2 + $0x30] sm:$0xff] }
 0x157   : > { %v2552_v19 = vpop.trf.xlu0 }
 0x158   : > { %938 = vmatmul.mubr.f32.gmra.mrb[56].mxu0 %v2660_v17  ;;  %1163 = vmatmul.mubr.f32.gmra.mrb[56].mxu1 %v2663_v18  ;;  %v2553_v21 = vunpack.i.l.bf16 %v2552_v19  ;;  %v2556_v22 = vunpack.i.h.bf16 %v2552_v19 }
 0x159   : > { %v2664_v20 = vpop.trf.xlu1 }
 0x15a   : > { %v2665_v23 = vunpack.i.l.bf16 %v2664_v20  ;;  %v2668_v24 = vunpack.i.h.bf16 %v2664_v20  ;;  %942 = vmatprep.mubr.f32.mxu0 %v2553_v21  ;;  %1167 = vmatprep.mubr.f32.mxu1 %v2556_v22 }
 0x15b   : > { %v2557_v25 = vpop.trf.xlu0 }
 0x15c   : > { %943 = vmatmul.mubr.f32.gmra.mrb[58].mxu0 %v2665_v23  ;;  %1168 = vmatmul.mubr.f32.gmra.mrb[58].mxu1 %v2668_v24  ;;  %v2558_v27 = vunpack.i.l.bf16 %v2557_v25  ;;  %v2561_v28 = vunpack.i.h.bf16 %v2557_v25  ;;  %v260_v23 = vld [vmem:[#allocation2 + $0x38] sm:$0xff] }
 0x15d   : > { %v2669_v26 = vpop.trf.xlu1 }
 0x15e   : > { %v2670_v29 = vunpack.i.l.bf16 %v2669_v26  ;;  %v2673_v30 = vunpack.i.h.bf16 %v2669_v26  ;;  %947 = vmatprep.mubr.f32.mxu0 %v2558_v27  ;;  %1172 = vmatprep.mubr.f32.mxu1 %v2561_v28 }
 0x15f   : > { %v2562_v31 = vpop.trf.xlu0 }
 0x160   : > { %948 = vmatmul.mubr.f32.gmra.mrb[60].mxu0 %v2670_v29  ;;  %1173 = vmatmul.mubr.f32.gmra.mrb[60].mxu1 %v2673_v30  ;;  %v2566_v32 = vunpack.i.h.bf16 %v2562_v31  ;;  %v2563_v33 = vunpack.i.l.bf16 %v2562_v31  ;;  %v261_v30 = vld [vmem:[#allocation2 + $0x40] sm:$0xff] }
 0x161   : > { %v2674_v34 = vpop.trf.xlu1 }
 0x162   : > { %v2678_v35 = vunpack.i.h.bf16 %v2674_v34  ;;  %v2675_v36 = vunpack.i.l.bf16 %v2674_v34  ;;  %952 = vmatprep.mubr.f32.mxu0 %v2563_v33  ;;  %1177 = vmatprep.mubr.f32.mxu1 %v2566_v32 }
 0x164   : > { %953 = vmatmul.mubr.f32.gmra.mrb[62].mxu0 %v2675_v36  ;;  %1178 = vmatmul.mubr.f32.gmra.mrb[62].mxu1 %v2678_v35 }
 0x1bb   : > { %v799_v37 = vpop.f32.mrb[0].mxu0  ;;  %v1024_v39 = vpop.f32.mrb[0].mxu1 }
 0x1bc   : > { %v1025_v40 = vadd.f32 %v1024_v39, %v799_v37  ;;  %v801_v41 = vpop.f32.mrb[1].mxu0  ;;  %v1026_v42 = vpop.f32.mrb[1].mxu1  ;;  %v262_v37 = vld [vmem:[#allocation2 + $0x48] sm:$0xff] }
 0x1be   : > { %v1183_v43 = vadd.f32 %v1025_v40, %v253_v38 }
 0x1bf   : > { %v804_v44 = vpop.f32.mrb[2].mxu0  ;;  %v1029_v46 = vpop.f32.mrb[2].mxu1 }
 0x1c0   : > { %1215 = vst [vmem:[#allocation2] sm:$0xff] %v1183_v43  ;;  %v1030_v47 = vadd.f32 %v1029_v46, %v804_v44  ;;  %v806_v48 = vpop.f32.mrb[3].mxu0  ;;  %v1031_v49 = vpop.f32.mrb[3].mxu1  ;;  %v263_v44 = vld [vmem:[#allocation2 + $0x50] sm:$0xff] }
 0x1c2   : > { %v1184_v50 = vadd.f32 %v1030_v47, %v254_v45 }
 0x1c3   : > { %v809_v51 = vpop.f32.mrb[4].mxu0  ;;  %v1034_v53 = vpop.f32.mrb[4].mxu1 }
 0x1c4   : > { %1216 = vst [vmem:[#allocation2 + $0x8] sm:$0xff] %v1184_v50  ;;  %v1035_v54 = vadd.f32 %v1034_v53, %v809_v51  ;;  %v811_v55 = vpop.f32.mrb[5].mxu0  ;;  %v1036_v56 = vpop.f32.mrb[5].mxu1  ;;  %v264_v51 = vld [vmem:[#allocation2 + $0x58] sm:$0xff] }
 0x1c6   : > { %v1185_v8 = vadd.f32 %v1035_v54, %v255_v52 }
 0x1c7   : > { %v814_v57 = vpop.f32.mrb[6].mxu0  ;;  %v1039_v59 = vpop.f32.mrb[6].mxu1 }
 0x1c8   : > { %1217 = vst [vmem:[#allocation2 + $0x10] sm:$0xff] %v1185_v8  ;;  %v1040_v60 = vadd.f32 %v1039_v59, %v814_v57  ;;  %v816_v61 = vpop.f32.mrb[7].mxu0  ;;  %v1041_v62 = vpop.f32.mrb[7].mxu1  ;;  %v265_v57 = vld [vmem:[#allocation2 + $0x60] sm:$0xff] }
 0x1ca   : > { %v1186_v63 = vadd.f32 %v1040_v60, %v256_v58 }
 0x1cb   : > { %v819_v0 = vpop.f32.mrb[8].mxu0  ;;  %v1044_v2 = vpop.f32.mrb[8].mxu1 }
 0x1cc   : > { %1218 = vst [vmem:[#allocation2 + $0x18] sm:$0xff] %v1186_v63  ;;  %v1045_v3 = vadd.f32 %v1044_v2, %v819_v0  ;;  %v821_v4 = vpop.f32.mrb[9].mxu0  ;;  %v1046_v5 = vpop.f32.mrb[9].mxu1  ;;  %v266_v0 = vld [vmem:[#allocation2 + $0x68] sm:$0xff] }
 0x1ce   : > { %v1187_v6 = vadd.f32 %v1045_v3, %v257_v1 }
 0x1cf   : > { %v824_v7 = vpop.f32.mrb[10].mxu0  ;;  %v1049_v10 = vpop.f32.mrb[10].mxu1 }
 0x1d0   : > { %1219 = vst [vmem:[#allocation2 + $0x20] sm:$0xff] %v1187_v6  ;;  %v1050_v11 = vadd.f32 %v1049_v10, %v824_v7  ;;  %v826_v12 = vpop.f32.mrb[11].mxu0  ;;  %v1051_v13 = vpop.f32.mrb[11].mxu1  ;;  %v267_v7 = vld [vmem:[#allocation2 + $0x70] sm:$0xff] }
 0x1d2   : > { %v1188_v14 = vadd.f32 %v1050_v11, %v258_v9 }
 0x1d3   : > { %v829_v15 = vpop.f32.mrb[12].mxu0  ;;  %v1054_v17 = vpop.f32.mrb[12].mxu1 }
 0x1d4   : > { %1220 = vst [vmem:[#allocation2 + $0x28] sm:$0xff] %v1188_v14  ;;  %v1055_v18 = vadd.f32 %v1054_v17, %v829_v15  ;;  %v831_v19 = vpop.f32.mrb[13].mxu0  ;;  %v1056_v20 = vpop.f32.mrb[13].mxu1  ;;  %v268_v15 = vld [vmem:[#allocation2 + $0x78] sm:$0xff] }
 0x1d6   : > { %v1189_v21 = vadd.f32 %v1055_v18, %v259_v16 }
 0x1d7   : > { %v834_v22 = vpop.f32.mrb[14].mxu0  ;;  %v1059_v24 = vpop.f32.mrb[14].mxu1 }
 0x1d8   : > { %1221 = vst [vmem:[#allocation2 + $0x30] sm:$0xff] %v1189_v21  ;;  %v1060_v25 = vadd.f32 %v1059_v24, %v834_v22  ;;  %v836_v26 = vpop.f32.mrb[15].mxu0  ;;  %v1061_v27 = vpop.f32.mrb[15].mxu1  ;;  %v269_v22 = vld [vmem:[#allocation2 + $0x80] sm:$0xff] }
 0x1da   : > { %v1190_v28 = vadd.f32 %v1060_v25, %v260_v23 }
 0x1db   : > { %v839_v29 = vpop.f32.mrb[16].mxu0  ;;  %v1064_v31 = vpop.f32.mrb[16].mxu1 }
 0x1dc   : > { %1222 = vst [vmem:[#allocation2 + $0x38] sm:$0xff] %v1190_v28  ;;  %v1065_v32 = vadd.f32 %v1064_v31, %v839_v29  ;;  %v841_v33 = vpop.f32.mrb[17].mxu0  ;;  %v1066_v34 = vpop.f32.mrb[17].mxu1  ;;  %v270_v29 = vld [vmem:[#allocation2 + $0x88] sm:$0xff] }
 0x1de   : > { %v1191_v35 = vadd.f32 %v1065_v32, %v261_v30 }
 0x1df   : > { %v844_v36 = vpop.f32.mrb[18].mxu0  ;;  %v1069_v38 = vpop.f32.mrb[18].mxu1 }
 0x1e0   : > { %1223 = vst [vmem:[#allocation2 + $0x40] sm:$0xff] %v1191_v35  ;;  %v1070_v39 = vadd.f32 %v1069_v38, %v844_v36  ;;  %v846_v40 = vpop.f32.mrb[19].mxu0  ;;  %v1071_v41 = vpop.f32.mrb[19].mxu1  ;;  %v271_v36 = vld [vmem:[#allocation2 + $0x90] sm:$0xff] }
 0x1e2   : > { %v1192_v42 = vadd.f32 %v1070_v39, %v262_v37 }
 0x1e3   : > { %v849_v43 = vpop.f32.mrb[20].mxu0  ;;  %v1074_v45 = vpop.f32.mrb[20].mxu1 }
 0x1e4   : > { %1224 = vst [vmem:[#allocation2 + $0x48] sm:$0xff] %v1192_v42  ;;  %v1075_v46 = vadd.f32 %v1074_v45, %v849_v43  ;;  %v851_v47 = vpop.f32.mrb[21].mxu0  ;;  %v1076_v48 = vpop.f32.mrb[21].mxu1  ;;  %v272_v43 = vld [vmem:[#allocation2 + $0x98] sm:$0xff] }
 0x1e6   : > { %v1193_v49 = vadd.f32 %v1075_v46, %v263_v44 }
 0x1e7   : > { %v854_v50 = vpop.f32.mrb[22].mxu0  ;;  %v1079_v52 = vpop.f32.mrb[22].mxu1 }
 0x1e8   : > { %1225 = vst [vmem:[#allocation2 + $0x50] sm:$0xff] %v1193_v49  ;;  %v1080_v53 = vadd.f32 %v1079_v52, %v854_v50  ;;  %v856_v54 = vpop.f32.mrb[23].mxu0  ;;  %v1081_v55 = vpop.f32.mrb[23].mxu1  ;;  %v273_v50 = vld [vmem:[#allocation2 + $0xa0] sm:$0xff] }
 0x1ea   : > { %v1194_v56 = vadd.f32 %v1080_v53, %v264_v51 }
 0x1eb   : > { %v859_v8 = vpop.f32.mrb[24].mxu0  ;;  %v1084_v58 = vpop.f32.mrb[24].mxu1 }
 0x1ec   : > { %1226 = vst [vmem:[#allocation2 + $0x58] sm:$0xff] %v1194_v56  ;;  %v1085_v59 = vadd.f32 %v1084_v58, %v859_v8  ;;  %v861_v60 = vpop.f32.mrb[25].mxu0  ;;  %v1086_v61 = vpop.f32.mrb[25].mxu1  ;;  %v274_v8 = vld [vmem:[#allocation2 + $0xa8] sm:$0xff] }
 0x1ee   : > { %v1195_v62 = vadd.f32 %v1085_v59, %v265_v57 }
 0x1ef   : > { %v864_v63 = vpop.f32.mrb[26].mxu0  ;;  %v1089_v1 = vpop.f32.mrb[26].mxu1 }
 0x1f0   : > { %1227 = vst [vmem:[#allocation2 + $0x60] sm:$0xff] %v1195_v62  ;;  %v1090_v2 = vadd.f32 %v1089_v1, %v864_v63  ;;  %v866_v3 = vpop.f32.mrb[27].mxu0  ;;  %v1091_v4 = vpop.f32.mrb[27].mxu1  ;;  %v275_v63 = vld [vmem:[#allocation2 + $0xb0] sm:$0xff] }
 0x1f2   : > { %v1196_v5 = vadd.f32 %v1090_v2, %v266_v0 }
 0x1f3   : > { %v869_v6 = vpop.f32.mrb[28].mxu0  ;;  %v1094_v9 = vpop.f32.mrb[28].mxu1 }
 0x1f4   : > { %1228 = vst [vmem:[#allocation2 + $0x68] sm:$0xff] %v1196_v5  ;;  %v1095_v10 = vadd.f32 %v1094_v9, %v869_v6  ;;  %v871_v11 = vpop.f32.mrb[29].mxu0  ;;  %v1096_v12 = vpop.f32.mrb[29].mxu1  ;;  %v276_v6 = vld [vmem:[#allocation2 + $0xb8] sm:$0xff] }
 0x1f6   : > { %v1197_v13 = vadd.f32 %v1095_v10, %v267_v7 }
 0x1f7   : > { %v874_v14 = vpop.f32.mrb[30].mxu0  ;;  %v1099_v16 = vpop.f32.mrb[30].mxu1 }
 0x1f8   : > { %1229 = vst [vmem:[#allocation2 + $0x70] sm:$0xff] %v1197_v13  ;;  %v1100_v17 = vadd.f32 %v1099_v16, %v874_v14  ;;  %v876_v18 = vpop.f32.mrb[31].mxu0  ;;  %v1101_v19 = vpop.f32.mrb[31].mxu1  ;;  %v277_v14 = vld [vmem:[#allocation2 + $0xc0] sm:$0xff] }
 0x1fa   : > { %v1198_v20 = vadd.f32 %v1100_v17, %v268_v15 }
 0x1fb   : > { %v879_v21 = vpop.f32.mrb[32].mxu0  ;;  %v1104_v23 = vpop.f32.mrb[32].mxu1 }
 0x1fc   : > { %1230 = vst [vmem:[#allocation2 + $0x78] sm:$0xff] %v1198_v20  ;;  %v1105_v24 = vadd.f32 %v1104_v23, %v879_v21  ;;  %v881_v25 = vpop.f32.mrb[33].mxu0  ;;  %v1106_v26 = vpop.f32.mrb[33].mxu1  ;;  %v278_v21 = vld [vmem:[#allocation2 + $0xc8] sm:$0xff] }
 0x1fe   : > { %v1199_v27 = vadd.f32 %v1105_v24, %v269_v22 }
 0x1ff   : > { %v884_v28 = vpop.f32.mrb[34].mxu0  ;;  %v1109_v30 = vpop.f32.mrb[34].mxu1 }
 0x200   : > { %1231 = vst [vmem:[#allocation2 + $0x80] sm:$0xff] %v1199_v27  ;;  %v1110_v31 = vadd.f32 %v1109_v30, %v884_v28  ;;  %v886_v32 = vpop.f32.mrb[35].mxu0  ;;  %v1111_v33 = vpop.f32.mrb[35].mxu1  ;;  %v279_v28 = vld [vmem:[#allocation2 + $0xd0] sm:$0xff] }
 0x202   : > { %v1200_v34 = vadd.f32 %v1110_v31, %v270_v29 }
 0x203   : > { %v889_v35 = vpop.f32.mrb[36].mxu0  ;;  %v1114_v37 = vpop.f32.mrb[36].mxu1 }
 0x204   : > { %1232 = vst [vmem:[#allocation2 + $0x88] sm:$0xff] %v1200_v34  ;;  %v1115_v38 = vadd.f32 %v1114_v37, %v889_v35  ;;  %v891_v39 = vpop.f32.mrb[37].mxu0  ;;  %v1116_v40 = vpop.f32.mrb[37].mxu1  ;;  %v280_v35 = vld [vmem:[#allocation2 + $0xd8] sm:$0xff] }
 0x206   : > { %v1201_v41 = vadd.f32 %v1115_v38, %v271_v36 }
 0x207   : > { %v894_v42 = vpop.f32.mrb[38].mxu0  ;;  %v1119_v44 = vpop.f32.mrb[38].mxu1 }
 0x208   : > { %1233 = vst [vmem:[#allocation2 + $0x90] sm:$0xff] %v1201_v41  ;;  %v1120_v45 = vadd.f32 %v1119_v44, %v894_v42  ;;  %v896_v46 = vpop.f32.mrb[39].mxu0  ;;  %v1121_v47 = vpop.f32.mrb[39].mxu1  ;;  %v281_v42 = vld [vmem:[#allocation2 + $0xe0] sm:$0xff] }
 0x20a   : > { %v1202_v48 = vadd.f32 %v1120_v45, %v272_v43 }
 0x20b   : > { %v899_v49 = vpop.f32.mrb[40].mxu0  ;;  %v1124_v51 = vpop.f32.mrb[40].mxu1 }
 0x20c   : > { %1234 = vst [vmem:[#allocation2 + $0x98] sm:$0xff] %v1202_v48  ;;  %v1125_v52 = vadd.f32 %v1124_v51, %v899_v49  ;;  %v901_v53 = vpop.f32.mrb[41].mxu0  ;;  %v1126_v54 = vpop.f32.mrb[41].mxu1  ;;  %v282_v49 = vld [vmem:[#allocation2 + $0xe8] sm:$0xff] }
 0x20e   : > { %v1203_v55 = vadd.f32 %v1125_v52, %v273_v50 }
 0x20f   : > { %v904_v56 = vpop.f32.mrb[42].mxu0  ;;  %v1129_v57 = vpop.f32.mrb[42].mxu1 }
 0x210   : > { %1235 = vst [vmem:[#allocation2 + $0xa0] sm:$0xff] %v1203_v55  ;;  %v1130_v58 = vadd.f32 %v1129_v57, %v904_v56  ;;  %v906_v59 = vpop.f32.mrb[43].mxu0  ;;  %v1131_v60 = vpop.f32.mrb[43].mxu1  ;;  %v283_v56 = vld [vmem:[#allocation2 + $0xf0] sm:$0xff] }
 0x212   : > { %v1204_v61 = vadd.f32 %v1130_v58, %v274_v8 }
 0x213   : > { %v909_v62 = vpop.f32.mrb[44].mxu0  ;;  %v1134_v0 = vpop.f32.mrb[44].mxu1 }
 0x214   : > { %1236 = vst [vmem:[#allocation2 + $0xa8] sm:$0xff] %v1204_v61  ;;  %v1135_v1 = vadd.f32 %v1134_v0, %v909_v62  ;;  %v911_v2 = vpop.f32.mrb[45].mxu0  ;;  %v1136_v3 = vpop.f32.mrb[45].mxu1  ;;  %v284_v62 = vld [vmem:[#allocation2 + $0xf8] sm:$0xff] }
 0x216   : > { %v1205_v4 = vadd.f32 %v1135_v1, %v275_v63 }
 0x217   : > { %v914_v5 = vpop.f32.mrb[46].mxu0  ;;  %v1139_v7 = vpop.f32.mrb[46].mxu1 }
 0x218   : > { %1237 = vst [vmem:[#allocation2 + $0xb0] sm:$0xff] %v1205_v4  ;;  %v1140_v9 = vadd.f32 %v1139_v7, %v914_v5  ;;  %v916_v10 = vpop.f32.mrb[47].mxu0  ;;  %v1141_v11 = vpop.f32.mrb[47].mxu1 }
 0x21a   : > { %v1206_v12 = vadd.f32 %v1140_v9, %v276_v6 }
 0x21b   : > { %v919_v13 = vpop.f32.mrb[48].mxu0  ;;  %v1144_v15 = vpop.f32.mrb[48].mxu1 }
 0x21c   : > { %1238 = vst [vmem:[#allocation2 + $0xb8] sm:$0xff] %v1206_v12  ;;  %v1145_v16 = vadd.f32 %v1144_v15, %v919_v13  ;;  %v921_v17 = vpop.f32.mrb[49].mxu0  ;;  %v1146_v18 = vpop.f32.mrb[49].mxu1 }
 0x21e   : > { %v1207_v19 = vadd.f32 %v1145_v16, %v277_v14 }
 0x21f   : > { %v924_v20 = vpop.f32.mrb[50].mxu0  ;;  %v1149_v22 = vpop.f32.mrb[50].mxu1 }
 0x220   : > { %1239 = vst [vmem:[#allocation2 + $0xc0] sm:$0xff] %v1207_v19  ;;  %v1150_v23 = vadd.f32 %v1149_v22, %v924_v20  ;;  %v926_v24 = vpop.f32.mrb[51].mxu0  ;;  %v1151_v25 = vpop.f32.mrb[51].mxu1 }
 0x222   : > { %v1208_v26 = vadd.f32 %v1150_v23, %v278_v21 }
 0x223   : > { %v929_v27 = vpop.f32.mrb[52].mxu0  ;;  %v1154_v29 = vpop.f32.mrb[52].mxu1 }
 0x224   : > { %1240 = vst [vmem:[#allocation2 + $0xc8] sm:$0xff] %v1208_v26  ;;  %v1155_v30 = vadd.f32 %v1154_v29, %v929_v27  ;;  %v931_v31 = vpop.f32.mrb[53].mxu0  ;;  %v1156_v32 = vpop.f32.mrb[53].mxu1 }
 0x226   : > { %v1209_v33 = vadd.f32 %v1155_v30, %v279_v28 }
 0x227   : > { %v934_v34 = vpop.f32.mrb[54].mxu0  ;;  %v1159_v36 = vpop.f32.mrb[54].mxu1 }
 0x228   : > { %1241 = vst [vmem:[#allocation2 + $0xd0] sm:$0xff] %v1209_v33  ;;  %v1160_v37 = vadd.f32 %v1159_v36, %v934_v34  ;;  %v936_v38 = vpop.f32.mrb[55].mxu0  ;;  %v1161_v39 = vpop.f32.mrb[55].mxu1 }
 0x22a   : > { %v1210_v40 = vadd.f32 %v1160_v37, %v280_v35 }
 0x22b   : > { %v939_v41 = vpop.f32.mrb[56].mxu0  ;;  %v1164_v43 = vpop.f32.mrb[56].mxu1 }
 0x22c   : > { %1242 = vst [vmem:[#allocation2 + $0xd8] sm:$0xff] %v1210_v40  ;;  %v1165_v44 = vadd.f32 %v1164_v43, %v939_v41  ;;  %v941_v45 = vpop.f32.mrb[57].mxu0  ;;  %v1166_v46 = vpop.f32.mrb[57].mxu1 }
 0x22e   : > { %v1211_v47 = vadd.f32 %v1165_v44, %v281_v42 }
 0x22f   : > { %v944_v48 = vpop.f32.mrb[58].mxu0  ;;  %v1169_v50 = vpop.f32.mrb[58].mxu1 }
 0x230   : > { %1243 = vst [vmem:[#allocation2 + $0xe0] sm:$0xff] %v1211_v47  ;;  %v1170_v51 = vadd.f32 %v1169_v50, %v944_v48  ;;  %v946_v52 = vpop.f32.mrb[59].mxu0  ;;  %v1171_v53 = vpop.f32.mrb[59].mxu1 }
 0x232   : > { %v1212_v54 = vadd.f32 %v1170_v51, %v282_v49 }
 0x233   : > { %v949_v55 = vpop.f32.mrb[60].mxu0  ;;  %v1174_v8 = vpop.f32.mrb[60].mxu1 }
 0x234   : > { %1244 = vst [vmem:[#allocation2 + $0xe8] sm:$0xff] %v1212_v54  ;;  %v1175_v57 = vadd.f32 %v1174_v8, %v949_v55  ;;  %v951_v58 = vpop.f32.mrb[61].mxu0  ;;  %v1176_v59 = vpop.f32.mrb[61].mxu1 }
 0x236   : > { %v1213_v60 = vadd.f32 %v1175_v57, %v283_v56 }
 0x237   : > { %v954_v61 = vpop.f32.mrb[62].mxu0  ;;  %v1179_v63 = vpop.f32.mrb[62].mxu1 }
 0x238   : > { %1245 = vst [vmem:[#allocation2 + $0xf0] sm:$0xff] %v1213_v60  ;;  %v1180_v0 = vadd.f32 %v1179_v63, %v954_v61  ;;  %v956_v1 = vpop.f32.mrb[63].mxu0  ;;  %v1181_v2 = vpop.f32.mrb[63].mxu1 }
 0x23a   : > { %v1214_v3 = vadd.f32 %v1180_v0, %v284_v62 }
 0x23c   : > { %1246 = vst [vmem:[#allocation2 + $0xf8] sm:$0xff] %v1214_v3 }
 0x23d PF: > { %p1981_p7 = scmp.ne.s32.totalorder %s2787_s9, 1 }
 0x23e   : > { %v1379_v4 = vld [vmem:[#allocation2] sm:$0xff] (!%p1981_p7)  ;;  %v1380_v5 = vld [vmem:[#allocation2 + $0x8] sm:$0xff] (!%p1981_p7)  ;;  %v1381_v6 = vld [vmem:[#allocation2 + $0x10] sm:$0xff] (!%p1981_p7)  ;;  %v2805_v7 = vmov (!%p1981_p7), 0.0|0.0  }
 0x23f   : > { %1250 = sbr.rel (%p1981_p7) target bundleno = 977 (0x3d1), region = 48  ;;  %2083 = vmatprep.subr.bf16.mxu0 (!%p1981_p7), %v2805_v7  ;;  %2131 = vmatprep.subr.bf16.mxu1 (!%p1981_p7), %v2805_v7  ;;  %v2084_v9 = vpack.c.bf16 (!%p1981_p7), %v1380_v5, %v1379_v4  ;;  %v1382_v10 = vld [vmem:[#allocation2 + $0x18] sm:$0xff] (!%p1981_p7)  ;;  %v1383_v12 = vld [vmem:[#allocation2 + $0x20] sm:$0xff] (!%p1981_p7)  ;;  %v1384_v13 = vld [vmem:[#allocation2 + $0x28] sm:$0xff] (!%p1981_p7) }
 0x240   : > { %v2087_v11 = vpack.c.bf16 (!%p1981_p7), %v1382_v10, %v1381_v6  ;;  %v2090_v14 = vpack.c.bf16 (!%p1981_p7), %v1384_v13, %v1383_v12  ;;  %v1385_v15 = vld [vmem:[#allocation2 + $0x30] sm:$0xff] (!%p1981_p7)  ;;  %v1386_v16 = vld [vmem:[#allocation2 + $0x38] sm:$0xff] (!%p1981_p7)  ;;  %v1252_v17 = vld [vmem:[#allocation3 + $0x8] sm:$0xff] (!%p1981_p7) }
 0x241   : > { %2085 = vmatpush1.bf16.msra.mxu0 (!%p1981_p7), %v2084_v9  ;;  %2147 = vmatpush1.bf16.msra.mxu1 (!%p1981_p7), %v2084_v9  ;;  %v2093_v18 = vpack.c.bf16 (!%p1981_p7), %v1386_v16, %v1385_v15  ;;  %v1316_v19 = vld [vmem:[#allocation3 + $0x208] sm:$0xff] (!%p1981_p7)  ;;  %v1387_v20 = vld [vmem:[#allocation2 + $0x40] sm:$0xff] (!%p1981_p7)  ;;  %v1389_v23 = vld [vmem:[#allocation2 + $0x50] sm:$0xff] (!%p1981_p7) }
 0x242   : > { %2086 = vmatprep.subr.bf16.mxu0 (!%p1981_p7), %v2805_v7  ;;  %2132 = vmatprep.subr.bf16.mxu1 (!%p1981_p7), %v2805_v7  ;;  %v1388_v21 = vld [vmem:[#allocation2 + $0x48] sm:$0xff] (!%p1981_p7)  ;;  %v1390_v24 = vld [vmem:[#allocation2 + $0x58] sm:$0xff] (!%p1981_p7)  ;;  %v1391_v26 = vld [vmem:[#allocation2 + $0x60] sm:$0xff] (!%p1981_p7) }
 0x243   : > { %1475 = vmatprep.mubr.f32.mxu0 (!%p1981_p7), %v1252_v17  ;;  %1635 = vmatprep.mubr.f32.mxu1 (!%p1981_p7), %v1316_v19  ;;  %v2096_v22 = vpack.c.bf16 (!%p1981_p7), %v1388_v21, %v1387_v20  ;;  %v2099_v25 = vpack.c.bf16 (!%p1981_p7), %v1390_v24, %v1389_v23  ;;  %v1392_v27 = vld [vmem:[#allocation2 + $0x68] sm:$0xff] (!%p1981_p7)  ;;  %v1393_v29 = vld [vmem:[#allocation2 + $0x70] sm:$0xff] (!%p1981_p7)  ;;  %v1394_v30 = vld [vmem:[#allocation2 + $0x78] sm:$0xff] (!%p1981_p7) }
 0x244   : > { %v2102_v28 = vpack.c.bf16 (!%p1981_p7), %v1392_v27, %v1391_v26  ;;  %v2105_v31 = vpack.c.bf16 (!%p1981_p7), %v1394_v30, %v1393_v29  ;;  %v1395_v32 = vld [vmem:[#allocation2 + $0x80] sm:$0xff] (!%p1981_p7)  ;;  %v1396_v33 = vld [vmem:[#allocation2 + $0x88] sm:$0xff] (!%p1981_p7)  ;;  %v1397_v35 = vld [vmem:[#allocation2 + $0x90] sm:$0xff] (!%p1981_p7) }
 0x245   : > { %2088 = vmatpush1.bf16.msra.mxu0 (!%p1981_p7), %v2087_v11  ;;  %2148 = vmatpush1.bf16.msra.mxu1 (!%p1981_p7), %v2087_v11  ;;  %v2108_v34 = vpack.c.bf16 (!%p1981_p7), %v1396_v33, %v1395_v32  ;;  %v1398_v36 = vld [vmem:[#allocation2 + $0x98] sm:$0xff] (!%p1981_p7)  ;;  %v1399_v38 = vld [vmem:[#allocation2 + $0xa0] sm:$0xff] (!%p1981_p7)  ;;  %v1400_v39 = vld [vmem:[#allocation2 + $0xa8] sm:$0xff] (!%p1981_p7) }
 0x246   : > { %2089 = vmatprep.subr.bf16.mxu0 %v2805_v7  ;;  %2133 = vmatprep.subr.bf16.mxu1 %v2805_v7  ;;  %v2111_v37 = vpack.c.bf16 %v1398_v36, %v1397_v35  ;;  %v2114_v40 = vpack.c.bf16 %v1400_v39, %v1399_v38  ;;  %v1401_v41 = vld [vmem:[#allocation2 + $0xb0] sm:$0xff]  ;;  %v1402_v42 = vld [vmem:[#allocation2 + $0xb8] sm:$0xff]  ;;  %v1403_v44 = vld [vmem:[#allocation2 + $0xc0] sm:$0xff] }
 0x247   : > { %v2117_v43 = vpack.c.bf16 %v1402_v42, %v1401_v41  ;;  %v1404_v45 = vld [vmem:[#allocation2 + $0xc8] sm:$0xff]  ;;  %v1405_v47 = vld [vmem:[#allocation2 + $0xd0] sm:$0xff]  ;;  %v1406_v48 = vld [vmem:[#allocation2 + $0xd8] sm:$0xff] }
 0x248   : > { %v2120_v46 = vpack.c.bf16 %v1404_v45, %v1403_v44  ;;  %v2123_v49 = vpack.c.bf16 %v1406_v48, %v1405_v47  ;;  %v1407_v50 = vld [vmem:[#allocation2 + $0xe0] sm:$0xff]  ;;  %v1408_v51 = vld [vmem:[#allocation2 + $0xe8] sm:$0xff]  ;;  %v1409_v53 = vld [vmem:[#allocation2 + $0xf0] sm:$0xff] }
 0x249   : > { %2091 = vmatpush1.bf16.msra.mxu0 %v2090_v14  ;;  %2149 = vmatpush1.bf16.msra.mxu1 %v2090_v14  ;;  %v2126_v52 = vpack.c.bf16 %v1408_v51, %v1407_v50  ;;  %v1410_v54 = vld [vmem:[#allocation2 + $0xf8] sm:$0xff]  ;;  %v1251_v56 = vld [vmem:[#allocation3] sm:$0xff]  ;;  %v1253_v59 = vld [vmem:[#allocation3 + $0x10] sm:$0xff] }
 0x24a   : > { %2092 = vmatprep.subr.bf16.mxu0 %v2805_v7  ;;  %2134 = vmatprep.subr.bf16.mxu1 %v2805_v7  ;;  %v2129_v55 = vpack.c.bf16 %v1410_v54, %v1409_v53  ;;  %v1315_v8 = vld [vmem:[#allocation3 + $0x200] sm:$0xff]  ;;  %v1254_v57 = vld [vmem:[#allocation3 + $0x18] sm:$0xff]  ;;  %v1317_v60 = vld [vmem:[#allocation3 + $0x210] sm:$0xff] }
 0x24b   : > { %v1318_v58 = vld [vmem:[#allocation3 + $0x218] sm:$0xff]  ;;  %v1256_v61 = vld [vmem:[#allocation3 + $0x28] sm:$0xff]  ;;  %v1255_v63 = vld [vmem:[#allocation3 + $0x20] sm:$0xff] }
 0x24c   : > { %v1320_v62 = vld [vmem:[#allocation3 + $0x228] sm:$0xff]  ;;  %v1319_v0 = vld [vmem:[#allocation3 + $0x220] sm:$0xff]  ;;  %v1258_v1 = vld [vmem:[#allocation3 + $0x38] sm:$0xff] }
 0x24d   : > { %2094 = vmatpush1.bf16.msra.mxu0 %v2093_v18  ;;  %2150 = vmatpush1.bf16.msra.mxu1 %v2093_v18  ;;  %v1322_v2 = vld [vmem:[#allocation3 + $0x238] sm:$0xff]  ;;  %v1257_v3 = vld [vmem:[#allocation3 + $0x30] sm:$0xff]  ;;  %v1260_v5 = vld [vmem:[#allocation3 + $0x48] sm:$0xff] }
 0x24e   : > { %2095 = vmatprep.subr.bf16.mxu0 %v2805_v7  ;;  %2135 = vmatprep.subr.bf16.mxu1 %v2805_v7  ;;  %v1321_v4 = vld [vmem:[#allocation3 + $0x230] sm:$0xff]  ;;  %v1324_v6 = vld [vmem:[#allocation3 + $0x248] sm:$0xff]  ;;  %v1323_v9 = vld [vmem:[#allocation3 + $0x240] sm:$0xff] }
 0x24f   : > { %v1262_v10 = vld [vmem:[#allocation3 + $0x58] sm:$0xff]  ;;  %v1261_v12 = vld [vmem:[#allocation3 + $0x50] sm:$0xff]  ;;  %v1264_v14 = vld [vmem:[#allocation3 + $0x68] sm:$0xff] }
 0x250   : > { %v1326_v11 = vld [vmem:[#allocation3 + $0x258] sm:$0xff]  ;;  %v1325_v13 = vld [vmem:[#allocation3 + $0x250] sm:$0xff]  ;;  %v1328_v15 = vld [vmem:[#allocation3 + $0x268] sm:$0xff] }
 0x251   : > { %2097 = vmatpush1.bf16.msra.mxu0 %v2096_v22  ;;  %2151 = vmatpush1.bf16.msra.mxu1 %v2096_v22  ;;  %v1263_v16 = vld [vmem:[#allocation3 + $0x60] sm:$0xff]  ;;  %v1266_v18 = vld [vmem:[#allocation3 + $0x78] sm:$0xff]  ;;  %v1265_v20 = vld [vmem:[#allocation3 + $0x70] sm:$0xff] }
 0x252   : > { %2098 = vmatprep.subr.bf16.mxu0 %v2805_v7  ;;  %2136 = vmatprep.subr.bf16.mxu1 %v2805_v7  ;;  %v1327_v17 = vld [vmem:[#allocation3 + $0x260] sm:$0xff]  ;;  %v1330_v19 = vld [vmem:[#allocation3 + $0x278] sm:$0xff]  ;;  %v1329_v21 = vld [vmem:[#allocation3 + $0x270] sm:$0xff] }
 0x253   : > { %v1268_v22 = vld [vmem:[#allocation3 + $0x88] sm:$0xff]  ;;  %v1267_v24 = vld [vmem:[#allocation3 + $0x80] sm:$0xff]  ;;  %v1270_v26 = vld [vmem:[#allocation3 + $0x98] sm:$0xff] }
 0x254   : > { %v1332_v23 = vld [vmem:[#allocation3 + $0x288] sm:$0xff]  ;;  %v1334_v27 = vld [vmem:[#allocation3 + $0x298] sm:$0xff]  ;;  %v1333_v29 = vld [vmem:[#allocation3 + $0x290] sm:$0xff] }
 0x255   : > { %2100 = vmatpush1.bf16.msra.mxu0 %v2099_v25  ;;  %2152 = vmatpush1.bf16.msra.mxu1 %v2099_v25  ;;  %v1331_v25 = vld [vmem:[#allocation3 + $0x280] sm:$0xff]  ;;  %v1272_v30 = vld [vmem:[#allocation3 + $0xa8] sm:$0xff]  ;;  %v1338_v35 = vld [vmem:[#allocation3 + $0x2b8] sm:$0xff] }
 0x256   : > { %2101 = vmatprep.subr.bf16.mxu0 %v2805_v7  ;;  %2137 = vmatprep.subr.bf16.mxu1 %v2805_v7  ;;  %v1271_v32 = vld [vmem:[#allocation3 + $0xa0] sm:$0xff]  ;;  %v1273_v36 = vld [vmem:[#allocation3 + $0xb0] sm:$0xff]  ;;  %v1276_v38 = vld [vmem:[#allocation3 + $0xc8] sm:$0xff] }
 0x257   : > { %v1335_v33 = vld [vmem:[#allocation3 + $0x2a0] sm:$0xff]  ;;  %v1340_v39 = vld [vmem:[#allocation3 + $0x2c8] sm:$0xff]  ;;  %v1278_v42 = vld [vmem:[#allocation3 + $0xd8] sm:$0xff] }
 0x258   : > { %v1339_v41 = vld [vmem:[#allocation3 + $0x2c0] sm:$0xff]  ;;  %v1277_v44 = vld [vmem:[#allocation3 + $0xd0] sm:$0xff]  ;;  %v1344_v47 = vld [vmem:[#allocation3 + $0x2e8] sm:$0xff] }
 0x259   : > { %2103 = vmatpush1.bf16.msra.mxu0 %v2102_v28  ;;  %2153 = vmatpush1.bf16.msra.mxu1 %v2102_v28  ;;  %v1269_v28 = vld [vmem:[#allocation3 + $0x90] sm:$0xff]  ;;  %v1279_v48 = vld [vmem:[#allocation3 + $0xe0] sm:$0xff]  ;;  %v1282_v50 = vld [vmem:[#allocation3 + $0xf8] sm:$0xff] }
 0x25a   : > { %2104 = vmatprep.subr.bf16.mxu0 %v2805_v7  ;;  %2138 = vmatprep.subr.bf16.mxu1 %v2805_v7  ;;  %v1341_v45 = vld [vmem:[#allocation3 + $0x2d0] sm:$0xff]  ;;  %v1346_v51 = vld [vmem:[#allocation3 + $0x2f8] sm:$0xff]  ;;  %v1284_v54 = vld [vmem:[#allocation3 + $0x108] sm:$0xff] }
 0x25b   : > { %v1345_v53 = vld [vmem:[#allocation3 + $0x2f0] sm:$0xff] }
 0x25d   : > { %2106 = vmatpush1.bf16.msra.mxu0 %v2105_v31  ;;  %2154 = vmatpush1.bf16.msra.mxu1 %v2105_v31  ;;  %v1336_v31 = vld [vmem:[#allocation3 + $0x2a8] sm:$0xff] }
 0x25e   : > { %2107 = vmatprep.subr.bf16.mxu0 %v2805_v7  ;;  %2139 = vmatprep.subr.bf16.mxu1 %v2805_v7 }
 0x261   : > { %2109 = vmatpush1.bf16.msra.mxu0 %v2108_v34  ;;  %2155 = vmatpush1.bf16.msra.mxu1 %v2108_v34  ;;  %v1274_v34 = vld [vmem:[#allocation3 + $0xb8] sm:$0xff] }
 0x262   : > { %2110 = vmatprep.subr.bf16.mxu0 %v2805_v7  ;;  %2140 = vmatprep.subr.bf16.mxu1 %v2805_v7 }
 0x265   : > { %2112 = vmatpush1.bf16.msra.mxu0 %v2111_v37  ;;  %2156 = vmatpush1.bf16.msra.mxu1 %v2111_v37  ;;  %v1337_v37 = vld [vmem:[#allocation3 + $0x2b0] sm:$0xff] }
 0x266   : > { %2113 = vmatprep.subr.bf16.mxu0 %v2805_v7  ;;  %2141 = vmatprep.subr.bf16.mxu1 %v2805_v7 }
 0x269   : > { %2115 = vmatpush1.bf16.msra.mxu0 %v2114_v40  ;;  %2157 = vmatpush1.bf16.msra.mxu1 %v2114_v40  ;;  %v1275_v40 = vld [vmem:[#allocation3 + $0xc0] sm:$0xff] }
 0x26a   : > { %2116 = vmatprep.subr.bf16.mxu0 %v2805_v7  ;;  %2142 = vmatprep.subr.bf16.mxu1 %v2805_v7 }
 0x26d   : > { %2118 = vmatpush1.bf16.msra.mxu0 %v2117_v43  ;;  %2158 = vmatpush1.bf16.msra.mxu1 %v2117_v43  ;;  %v1342_v43 = vld [vmem:[#allocation3 + $0x2d8] sm:$0xff] }
 0x26e   : > { %2119 = vmatprep.subr.bf16.mxu0 %v2805_v7  ;;  %2143 = vmatprep.subr.bf16.mxu1 %v2805_v7 }
 0x271   : > { %2121 = vmatpush1.bf16.msra.mxu0 %v2120_v46  ;;  %2159 = vmatpush1.bf16.msra.mxu1 %v2120_v46  ;;  %v1280_v46 = vld [vmem:[#allocation3 + $0xe8] sm:$0xff] }
 0x272   : > { %2122 = vmatprep.subr.bf16.mxu0 %v2805_v7  ;;  %2144 = vmatprep.subr.bf16.mxu1 %v2805_v7 }
 0x275   : > { %2124 = vmatpush1.bf16.msra.mxu0 %v2123_v49  ;;  %2160 = vmatpush1.bf16.msra.mxu1 %v2123_v49  ;;  %v1343_v49 = vld [vmem:[#allocation3 + $0x2e0] sm:$0xff] }
 0x276   : > { %2125 = vmatprep.subr.bf16.mxu0 %v2805_v7  ;;  %2145 = vmatprep.subr.bf16.mxu1 %v2805_v7 }
 0x279   : > { %2127 = vmatpush1.bf16.msra.mxu0 %v2126_v52  ;;  %2161 = vmatpush1.bf16.msra.mxu1 %v2126_v52  ;;  %v1281_v52 = vld [vmem:[#allocation3 + $0xf0] sm:$0xff] }
 0x27a   : > { %2128 = vmatprep.subr.bf16.mxu0 %v2805_v7  ;;  %2146 = vmatprep.subr.bf16.mxu1 %v2805_v7  ;;  %v1259_v7 = vld [vmem:[#allocation3 + $0x40] sm:$0xff] }
 0x27d   : > { %2130 = vmatpush1.bf16.msra.mxu0 %v2129_v55  ;;  %2162 = vmatpush1.bf16.msra.mxu1 %v2129_v55  ;;  %v1348_v55 = vld [vmem:[#allocation3 + $0x308] sm:$0xff] }
 0x280   : > { %1476 = vmatmul.mubr.f32.vlgmr.msra.gmra.mrb[0].mxu0 %v1251_v56  ;;  %1636 = vmatmul.mubr.f32.vlgmr.msra.gmra.mrb[0].mxu1 %v1315_v8  ;;  %v1283_v56 = vld [vmem:[#allocation3 + $0x100] sm:$0xff] }
 0x281   : > { %1480 = vmatprep.mubr.f32.mxu0 %v1254_v57  ;;  %1640 = vmatprep.mubr.f32.mxu1 %v1318_v58  ;;  %v1347_v8 = vld [vmem:[#allocation3 + $0x300] sm:$0xff]  ;;  %v1286_v57 = vld [vmem:[#allocation3 + $0x118] sm:$0xff] }
 0x282   : > { %v1350_v58 = vld [vmem:[#allocation3 + $0x318] sm:$0xff] }
 0x284   : > { %1481 = vmatmul.mubr.f32.gmra.mrb[2].mxu0 %v1253_v59  ;;  %1641 = vmatmul.mubr.f32.gmra.mrb[2].mxu1 %v1317_v60  ;;  %v1285_v59 = vld [vmem:[#allocation3 + $0x110] sm:$0xff] }
 0x285   : > { %1485 = vmatprep.mubr.f32.mxu0 %v1256_v61  ;;  %1645 = vmatprep.mubr.f32.mxu1 %v1320_v62  ;;  %v1349_v60 = vld [vmem:[#allocation3 + $0x310] sm:$0xff]  ;;  %v1288_v61 = vld [vmem:[#allocation3 + $0x128] sm:$0xff] }
 0x286   : > { %v1352_v62 = vld [vmem:[#allocation3 + $0x328] sm:$0xff] }
 0x288   : > { %1486 = vmatmul.mubr.f32.gmra.mrb[4].mxu0 %v1255_v63  ;;  %1646 = vmatmul.mubr.f32.gmra.mrb[4].mxu1 %v1319_v0  ;;  %v1287_v63 = vld [vmem:[#allocation3 + $0x120] sm:$0xff] }
 0x289   : > { %1490 = vmatprep.mubr.f32.mxu0 %v1258_v1  ;;  %1650 = vmatprep.mubr.f32.mxu1 %v1322_v2  ;;  %v1351_v0 = vld [vmem:[#allocation3 + $0x320] sm:$0xff]  ;;  %v1290_v1 = vld [vmem:[#allocation3 + $0x138] sm:$0xff] }
 0x28a   : > { %v1354_v2 = vld [vmem:[#allocation3 + $0x338] sm:$0xff] }
 0x28c   : > { %1491 = vmatmul.mubr.f32.gmra.mrb[6].mxu0 %v1257_v3  ;;  %1651 = vmatmul.mubr.f32.gmra.mrb[6].mxu1 %v1321_v4  ;;  %v1289_v3 = vld [vmem:[#allocation3 + $0x130] sm:$0xff] }
 0x28d   : > { %1495 = vmatprep.mubr.f32.mxu0 %v1260_v5  ;;  %1655 = vmatprep.mubr.f32.mxu1 %v1324_v6  ;;  %v1353_v4 = vld [vmem:[#allocation3 + $0x330] sm:$0xff]  ;;  %v1292_v5 = vld [vmem:[#allocation3 + $0x148] sm:$0xff] }
 0x28e   : > { %v1356_v6 = vld [vmem:[#allocation3 + $0x348] sm:$0xff] }
 0x290   : > { %1496 = vmatmul.mubr.f32.gmra.mrb[8].mxu0 %v1259_v7  ;;  %1656 = vmatmul.mubr.f32.gmra.mrb[8].mxu1 %v1323_v9  ;;  %v1291_v7 = vld [vmem:[#allocation3 + $0x140] sm:$0xff] }
 0x291   : > { %1500 = vmatprep.mubr.f32.mxu0 %v1262_v10  ;;  %1660 = vmatprep.mubr.f32.mxu1 %v1326_v11  ;;  %v1355_v9 = vld [vmem:[#allocation3 + $0x340] sm:$0xff]  ;;  %v1294_v10 = vld [vmem:[#allocation3 + $0x158] sm:$0xff] }
 0x292   : > { %v1358_v11 = vld [vmem:[#allocation3 + $0x358] sm:$0xff] }
 0x294   : > { %1501 = vmatmul.mubr.f32.gmra.mrb[10].mxu0 %v1261_v12  ;;  %1661 = vmatmul.mubr.f32.gmra.mrb[10].mxu1 %v1325_v13  ;;  %v1293_v12 = vld [vmem:[#allocation3 + $0x150] sm:$0xff] }
 0x295   : > { %1505 = vmatprep.mubr.f32.mxu0 %v1264_v14  ;;  %1665 = vmatprep.mubr.f32.mxu1 %v1328_v15  ;;  %v1357_v13 = vld [vmem:[#allocation3 + $0x350] sm:$0xff]  ;;  %v1296_v14 = vld [vmem:[#allocation3 + $0x168] sm:$0xff] }
 0x296   : > { %v1360_v15 = vld [vmem:[#allocation3 + $0x368] sm:$0xff] }
 0x298   : > { %1506 = vmatmul.mubr.f32.gmra.mrb[12].mxu0 %v1263_v16  ;;  %1666 = vmatmul.mubr.f32.gmra.mrb[12].mxu1 %v1327_v17  ;;  %v1295_v16 = vld [vmem:[#allocation3 + $0x160] sm:$0xff] }
 0x299   : > { %1510 = vmatprep.mubr.f32.mxu0 %v1266_v18  ;;  %1670 = vmatprep.mubr.f32.mxu1 %v1330_v19  ;;  %v1359_v17 = vld [vmem:[#allocation3 + $0x360] sm:$0xff]  ;;  %v1298_v18 = vld [vmem:[#allocation3 + $0x178] sm:$0xff] }
 0x29a   : > { %v1362_v19 = vld [vmem:[#allocation3 + $0x378] sm:$0xff] }
 0x29c   : > { %1511 = vmatmul.mubr.f32.gmra.mrb[14].mxu0 %v1265_v20  ;;  %1671 = vmatmul.mubr.f32.gmra.mrb[14].mxu1 %v1329_v21  ;;  %v1297_v20 = vld [vmem:[#allocation3 + $0x170] sm:$0xff] }
 0x29d   : > { %1515 = vmatprep.mubr.f32.mxu0 %v1268_v22  ;;  %1675 = vmatprep.mubr.f32.mxu1 %v1332_v23  ;;  %v1361_v21 = vld [vmem:[#allocation3 + $0x370] sm:$0xff]  ;;  %v1300_v22 = vld [vmem:[#allocation3 + $0x188] sm:$0xff] }
 0x29e   : > { %v1364_v23 = vld [vmem:[#allocation3 + $0x388] sm:$0xff] }
 0x2a0   : > { %1516 = vmatmul.mubr.f32.gmra.mrb[16].mxu0 %v1267_v24  ;;  %1676 = vmatmul.mubr.f32.gmra.mrb[16].mxu1 %v1331_v25  ;;  %v1299_v24 = vld [vmem:[#allocation3 + $0x180] sm:$0xff] }
 0x2a1   : > { %1520 = vmatprep.mubr.f32.mxu0 %v1270_v26  ;;  %1680 = vmatprep.mubr.f32.mxu1 %v1334_v27  ;;  %v1363_v25 = vld [vmem:[#allocation3 + $0x380] sm:$0xff]  ;;  %v1302_v26 = vld [vmem:[#allocation3 + $0x198] sm:$0xff] }
 0x2a2   : > { %v1366_v27 = vld [vmem:[#allocation3 + $0x398] sm:$0xff] }
 0x2a4   : > { %1521 = vmatmul.mubr.f32.gmra.mrb[18].mxu0 %v1269_v28  ;;  %1681 = vmatmul.mubr.f32.gmra.mrb[18].mxu1 %v1333_v29  ;;  %v1301_v28 = vld [vmem:[#allocation3 + $0x190] sm:$0xff] }
 0x2a5   : > { %1525 = vmatprep.mubr.f32.mxu0 %v1272_v30  ;;  %1685 = vmatprep.mubr.f32.mxu1 %v1336_v31  ;;  %v1365_v29 = vld [vmem:[#allocation3 + $0x390] sm:$0xff]  ;;  %v1304_v30 = vld [vmem:[#allocation3 + $0x1a8] sm:$0xff] }
 0x2a6   : > { %v1368_v31 = vld [vmem:[#allocation3 + $0x3a8] sm:$0xff] }
 0x2a8   : > { %1526 = vmatmul.mubr.f32.gmra.mrb[20].mxu0 %v1271_v32  ;;  %1686 = vmatmul.mubr.f32.gmra.mrb[20].mxu1 %v1335_v33  ;;  %v1303_v32 = vld [vmem:[#allocation3 + $0x1a0] sm:$0xff] }
 0x2a9   : > { %1530 = vmatprep.mubr.f32.mxu0 %v1274_v34  ;;  %1690 = vmatprep.mubr.f32.mxu1 %v1338_v35  ;;  %v1367_v33 = vld [vmem:[#allocation3 + $0x3a0] sm:$0xff]  ;;  %v1306_v34 = vld [vmem:[#allocation3 + $0x1b8] sm:$0xff] }
 0x2aa   : > { %v1370_v35 = vld [vmem:[#allocation3 + $0x3b8] sm:$0xff] }
 0x2ac   : > { %1531 = vmatmul.mubr.f32.gmra.mrb[22].mxu0 %v1273_v36  ;;  %1691 = vmatmul.mubr.f32.gmra.mrb[22].mxu1 %v1337_v37  ;;  %v1305_v36 = vld [vmem:[#allocation3 + $0x1b0] sm:$0xff] }
 0x2ad   : > { %1535 = vmatprep.mubr.f32.mxu0 %v1276_v38  ;;  %1695 = vmatprep.mubr.f32.mxu1 %v1340_v39  ;;  %v1369_v37 = vld [vmem:[#allocation3 + $0x3b0] sm:$0xff]  ;;  %v1308_v38 = vld [vmem:[#allocation3 + $0x1c8] sm:$0xff] }
 0x2ae   : > { %v1372_v39 = vld [vmem:[#allocation3 + $0x3c8] sm:$0xff] }
 0x2b0   : > { %1536 = vmatmul.mubr.f32.gmra.mrb[24].mxu0 %v1275_v40  ;;  %1696 = vmatmul.mubr.f32.gmra.mrb[24].mxu1 %v1339_v41  ;;  %v1307_v40 = vld [vmem:[#allocation3 + $0x1c0] sm:$0xff] }
 0x2b1   : > { %1540 = vmatprep.mubr.f32.mxu0 %v1278_v42  ;;  %1700 = vmatprep.mubr.f32.mxu1 %v1342_v43  ;;  %v1371_v41 = vld [vmem:[#allocation3 + $0x3c0] sm:$0xff]  ;;  %v1310_v42 = vld [vmem:[#allocation3 + $0x1d8] sm:$0xff] }
 0x2b2   : > { %v1374_v43 = vld [vmem:[#allocation3 + $0x3d8] sm:$0xff] }
 0x2b4   : > { %1541 = vmatmul.mubr.f32.gmra.mrb[26].mxu0 %v1277_v44  ;;  %1701 = vmatmul.mubr.f32.gmra.mrb[26].mxu1 %v1341_v45  ;;  %v1309_v44 = vld [vmem:[#allocation3 + $0x1d0] sm:$0xff] }
 0x2b5   : > { %1545 = vmatprep.mubr.f32.mxu0 %v1280_v46  ;;  %1705 = vmatprep.mubr.f32.mxu1 %v1344_v47  ;;  %v1373_v45 = vld [vmem:[#allocation3 + $0x3d0] sm:$0xff]  ;;  %v1312_v46 = vld [vmem:[#allocation3 + $0x1e8] sm:$0xff] }
 0x2b6   : > { %v1376_v47 = vld [vmem:[#allocation3 + $0x3e8] sm:$0xff] }
 0x2b8   : > { %1546 = vmatmul.mubr.f32.gmra.mrb[28].mxu0 %v1279_v48  ;;  %1706 = vmatmul.mubr.f32.gmra.mrb[28].mxu1 %v1343_v49  ;;  %v1311_v48 = vld [vmem:[#allocation3 + $0x1e0] sm:$0xff] }
 0x2b9   : > { %1550 = vmatprep.mubr.f32.mxu0 %v1282_v50  ;;  %1710 = vmatprep.mubr.f32.mxu1 %v1346_v51  ;;  %v1375_v49 = vld [vmem:[#allocation3 + $0x3e0] sm:$0xff]  ;;  %v1314_v50 = vld [vmem:[#allocation3 + $0x1f8] sm:$0xff] }
 0x2ba   : > { %v1378_v51 = vld [vmem:[#allocation3 + $0x3f8] sm:$0xff] }
 0x2bc   : > { %1551 = vmatmul.mubr.f32.gmra.mrb[30].mxu0 %v1281_v52  ;;  %1711 = vmatmul.mubr.f32.gmra.mrb[30].mxu1 %v1345_v53  ;;  %v1313_v52 = vld [vmem:[#allocation3 + $0x1f0] sm:$0xff] }
 0x2bd   : > { %1555 = vmatprep.mubr.f32.mxu0 %v1284_v54  ;;  %1715 = vmatprep.mubr.f32.mxu1 %v1348_v55  ;;  %v1377_v53 = vld [vmem:[#allocation3 + $0x3f0] sm:$0xff] }
 0x2c0   : > { %1556 = vmatmul.mubr.f32.gmra.mrb[32].mxu0 %v1283_v56  ;;  %1716 = vmatmul.mubr.f32.gmra.mrb[32].mxu1 %v1347_v8 }
 0x2c1   : > { %1560 = vmatprep.mubr.f32.mxu0 %v1286_v57  ;;  %1720 = vmatprep.mubr.f32.mxu1 %v1350_v58 }
 0x2c4   : > { %1561 = vmatmul.mubr.f32.gmra.mrb[34].mxu0 %v1285_v59  ;;  %1721 = vmatmul.mubr.f32.gmra.mrb[34].mxu1 %v1349_v60 }
 0x2c5   : > { %1565 = vmatprep.mubr.f32.mxu0 %v1288_v61  ;;  %1725 = vmatprep.mubr.f32.mxu1 %v1352_v62 }
 0x2c8   : > { %1566 = vmatmul.mubr.f32.gmra.mrb[36].mxu0 %v1287_v63  ;;  %1726 = vmatmul.mubr.f32.gmra.mrb[36].mxu1 %v1351_v0 }
 0x2c9   : > { %1570 = vmatprep.mubr.f32.mxu0 %v1290_v1  ;;  %1730 = vmatprep.mubr.f32.mxu1 %v1354_v2 }
 0x2cc   : > { %1571 = vmatmul.mubr.f32.gmra.mrb[38].mxu0 %v1289_v3  ;;  %1731 = vmatmul.mubr.f32.gmra.mrb[38].mxu1 %v1353_v4 }
 0x2cd   : > { %1575 = vmatprep.mubr.f32.mxu0 %v1292_v5  ;;  %1735 = vmatprep.mubr.f32.mxu1 %v1356_v6 }
 0x2d0   : > { %1576 = vmatmul.mubr.f32.gmra.mrb[40].mxu0 %v1291_v7  ;;  %1736 = vmatmul.mubr.f32.gmra.mrb[40].mxu1 %v1355_v9 }
 0x2d1   : > { %1580 = vmatprep.mubr.f32.mxu0 %v1294_v10  ;;  %1740 = vmatprep.mubr.f32.mxu1 %v1358_v11 }
 0x2d4   : > { %1581 = vmatmul.mubr.f32.gmra.mrb[42].mxu0 %v1293_v12  ;;  %1741 = vmatmul.mubr.f32.gmra.mrb[42].mxu1 %v1357_v13 }
 0x2d5   : > { %1585 = vmatprep.mubr.f32.mxu0 %v1296_v14  ;;  %1745 = vmatprep.mubr.f32.mxu1 %v1360_v15 }
 0x2d8   : > { %1586 = vmatmul.mubr.f32.gmra.mrb[44].mxu0 %v1295_v16  ;;  %1746 = vmatmul.mubr.f32.gmra.mrb[44].mxu1 %v1359_v17 }
 0x2d9   : > { %1590 = vmatprep.mubr.f32.mxu0 %v1298_v18  ;;  %1750 = vmatprep.mubr.f32.mxu1 %v1362_v19 }
 0x2dc   : > { %1591 = vmatmul.mubr.f32.gmra.mrb[46].mxu0 %v1297_v20  ;;  %1751 = vmatmul.mubr.f32.gmra.mrb[46].mxu1 %v1361_v21 }
 0x2dd   : > { %1595 = vmatprep.mubr.f32.mxu0 %v1300_v22  ;;  %1755 = vmatprep.mubr.f32.mxu1 %v1364_v23 }
 0x2e0   : > { %1596 = vmatmul.mubr.f32.gmra.mrb[48].mxu0 %v1299_v24  ;;  %1756 = vmatmul.mubr.f32.gmra.mrb[48].mxu1 %v1363_v25 }
 0x2e1   : > { %1600 = vmatprep.mubr.f32.mxu0 %v1302_v26  ;;  %1760 = vmatprep.mubr.f32.mxu1 %v1366_v27 }
 0x2e4   : > { %1601 = vmatmul.mubr.f32.gmra.mrb[50].mxu0 %v1301_v28  ;;  %1761 = vmatmul.mubr.f32.gmra.mrb[50].mxu1 %v1365_v29 }
 0x2e5   : > { %1605 = vmatprep.mubr.f32.mxu0 %v1304_v30  ;;  %1765 = vmatprep.mubr.f32.mxu1 %v1368_v31 }
 0x2e8   : > { %1606 = vmatmul.mubr.f32.gmra.mrb[52].mxu0 %v1303_v32  ;;  %1766 = vmatmul.mubr.f32.gmra.mrb[52].mxu1 %v1367_v33 }
 0x2e9   : > { %1610 = vmatprep.mubr.f32.mxu0 %v1306_v34  ;;  %1770 = vmatprep.mubr.f32.mxu1 %v1370_v35 }
 0x2ec   : > { %1611 = vmatmul.mubr.f32.gmra.mrb[54].mxu0 %v1305_v36  ;;  %1771 = vmatmul.mubr.f32.gmra.mrb[54].mxu1 %v1369_v37 }
 0x2ed   : > { %1615 = vmatprep.mubr.f32.mxu0 %v1308_v38  ;;  %1775 = vmatprep.mubr.f32.mxu1 %v1372_v39 }
 0x2f0   : > { %1616 = vmatmul.mubr.f32.gmra.mrb[56].mxu0 %v1307_v40  ;;  %1776 = vmatmul.mubr.f32.gmra.mrb[56].mxu1 %v1371_v41 }
 0x2f1   : > { %1620 = vmatprep.mubr.f32.mxu0 %v1310_v42  ;;  %1780 = vmatprep.mubr.f32.mxu1 %v1374_v43 }
 0x2f4   : > { %1621 = vmatmul.mubr.f32.gmra.mrb[58].mxu0 %v1309_v44  ;;  %1781 = vmatmul.mubr.f32.gmra.mrb[58].mxu1 %v1373_v45 }
 0x2f5   : > { %1625 = vmatprep.mubr.f32.mxu0 %v1312_v46  ;;  %1785 = vmatprep.mubr.f32.mxu1 %v1376_v47 }
 0x2f8   : > { %1626 = vmatmul.mubr.f32.gmra.mrb[60].mxu0 %v1311_v48  ;;  %1786 = vmatmul.mubr.f32.gmra.mrb[60].mxu1 %v1375_v49 }
 0x2f9   : > { %1630 = vmatprep.mubr.f32.mxu0 %v1314_v50  ;;  %1790 = vmatprep.mubr.f32.mxu1 %v1378_v51 }
 0x2fc   : > { %1631 = vmatmul.mubr.f32.gmra.mrb[62].mxu0 %v1313_v52  ;;  %1791 = vmatmul.mubr.f32.gmra.mrb[62].mxu1 %v1377_v53 }
 0x353   : > { %v1477_v54 = vpop.f32.mrb[0].mxu0  ;;  %v1637_v55 = vpop.f32.mrb[0].mxu1 }
 0x354   : > { %1796 = vst [vmem:[#allocation8] sm:$0xff] %v1477_v54  ;;  %1828 = vst [vmem:[#allocation8 + $0x100] sm:$0xff] %v1637_v55  ;;  %v1479_v56 = vpop.f32.mrb[1].mxu0  ;;  %v1639_v8 = vpop.f32.mrb[1].mxu1 }
 0x357   : > { %v1482_v57 = vpop.f32.mrb[2].mxu0  ;;  %v1642_v58 = vpop.f32.mrb[2].mxu1 }
 0x358   : > { %1797 = vst [vmem:[#allocation8 + $0x8] sm:$0xff] %v1482_v57  ;;  %1829 = vst [vmem:[#allocation8 + $0x108] sm:$0xff] %v1642_v58  ;;  %v1484_v59 = vpop.f32.mrb[3].mxu0  ;;  %v1644_v60 = vpop.f32.mrb[3].mxu1 }
 0x35b   : > { %v1487_v61 = vpop.f32.mrb[4].mxu0  ;;  %v1647_v62 = vpop.f32.mrb[4].mxu1 }
 0x35c   : > { %1798 = vst [vmem:[#allocation8 + $0x10] sm:$0xff] %v1487_v61  ;;  %1830 = vst [vmem:[#allocation8 + $0x110] sm:$0xff] %v1647_v62  ;;  %v1489_v63 = vpop.f32.mrb[5].mxu0  ;;  %v1649_v0 = vpop.f32.mrb[5].mxu1 }
 0x35f   : > { %v1492_v1 = vpop.f32.mrb[6].mxu0  ;;  %v1652_v2 = vpop.f32.mrb[6].mxu1 }
 0x360   : > { %1799 = vst [vmem:[#allocation8 + $0x18] sm:$0xff] %v1492_v1  ;;  %1831 = vst [vmem:[#allocation8 + $0x118] sm:$0xff] %v1652_v2  ;;  %v1494_v3 = vpop.f32.mrb[7].mxu0  ;;  %v1654_v4 = vpop.f32.mrb[7].mxu1 }
 0x363   : > { %v1497_v5 = vpop.f32.mrb[8].mxu0  ;;  %v1657_v6 = vpop.f32.mrb[8].mxu1 }
 0x364   : > { %1800 = vst [vmem:[#allocation8 + $0x20] sm:$0xff] %v1497_v5  ;;  %1832 = vst [vmem:[#allocation8 + $0x120] sm:$0xff] %v1657_v6  ;;  %v1499_v7 = vpop.f32.mrb[9].mxu0  ;;  %v1659_v9 = vpop.f32.mrb[9].mxu1 }
 0x367   : > { %v1502_v10 = vpop.f32.mrb[10].mxu0  ;;  %v1662_v11 = vpop.f32.mrb[10].mxu1 }
 0x368   : > { %1801 = vst [vmem:[#allocation8 + $0x28] sm:$0xff] %v1502_v10  ;;  %1833 = vst [vmem:[#allocation8 + $0x128] sm:$0xff] %v1662_v11  ;;  %v1504_v12 = vpop.f32.mrb[11].mxu0  ;;  %v1664_v13 = vpop.f32.mrb[11].mxu1 }
 0x36b   : > { %v1507_v14 = vpop.f32.mrb[12].mxu0  ;;  %v1667_v15 = vpop.f32.mrb[12].mxu1 }
 0x36c   : > { %1802 = vst [vmem:[#allocation8 + $0x30] sm:$0xff] %v1507_v14  ;;  %1834 = vst [vmem:[#allocation8 + $0x130] sm:$0xff] %v1667_v15  ;;  %v1509_v16 = vpop.f32.mrb[13].mxu0  ;;  %v1669_v17 = vpop.f32.mrb[13].mxu1 }
 0x36f   : > { %v1512_v18 = vpop.f32.mrb[14].mxu0  ;;  %v1672_v19 = vpop.f32.mrb[14].mxu1 }
 0x370   : > { %1803 = vst [vmem:[#allocation8 + $0x38] sm:$0xff] %v1512_v18  ;;  %1835 = vst [vmem:[#allocation8 + $0x138] sm:$0xff] %v1672_v19  ;;  %v1514_v20 = vpop.f32.mrb[15].mxu0  ;;  %v1674_v21 = vpop.f32.mrb[15].mxu1 }
 0x373   : > { %v1517_v22 = vpop.f32.mrb[16].mxu0  ;;  %v1677_v23 = vpop.f32.mrb[16].mxu1 }
 0x374   : > { %1804 = vst [vmem:[#allocation8 + $0x40] sm:$0xff] %v1517_v22  ;;  %1836 = vst [vmem:[#allocation8 + $0x140] sm:$0xff] %v1677_v23  ;;  %v1519_v24 = vpop.f32.mrb[17].mxu0  ;;  %v1679_v25 = vpop.f32.mrb[17].mxu1 }
 0x377   : > { %v1522_v26 = vpop.f32.mrb[18].mxu0  ;;  %v1682_v27 = vpop.f32.mrb[18].mxu1 }
 0x378   : > { %1805 = vst [vmem:[#allocation8 + $0x48] sm:$0xff] %v1522_v26  ;;  %1837 = vst [vmem:[#allocation8 + $0x148] sm:$0xff] %v1682_v27  ;;  %v1524_v28 = vpop.f32.mrb[19].mxu0  ;;  %v1684_v29 = vpop.f32.mrb[19].mxu1 }
 0x37b   : > { %v1527_v30 = vpop.f32.mrb[20].mxu0  ;;  %v1687_v31 = vpop.f32.mrb[20].mxu1 }
 0x37c   : > { %1806 = vst [vmem:[#allocation8 + $0x50] sm:$0xff] %v1527_v30  ;;  %1838 = vst [vmem:[#allocation8 + $0x150] sm:$0xff] %v1687_v31  ;;  %v1529_v32 = vpop.f32.mrb[21].mxu0  ;;  %v1689_v33 = vpop.f32.mrb[21].mxu1 }
 0x37f   : > { %v1532_v34 = vpop.f32.mrb[22].mxu0  ;;  %v1692_v35 = vpop.f32.mrb[22].mxu1 }
 0x380   : > { %1807 = vst [vmem:[#allocation8 + $0x58] sm:$0xff] %v1532_v34  ;;  %1839 = vst [vmem:[#allocation8 + $0x158] sm:$0xff] %v1692_v35  ;;  %v1534_v36 = vpop.f32.mrb[23].mxu0  ;;  %v1694_v37 = vpop.f32.mrb[23].mxu1 }
 0x383   : > { %v1537_v38 = vpop.f32.mrb[24].mxu0  ;;  %v1697_v39 = vpop.f32.mrb[24].mxu1 }
 0x384   : > { %1808 = vst [vmem:[#allocation8 + $0x60] sm:$0xff] %v1537_v38  ;;  %1840 = vst [vmem:[#allocation8 + $0x160] sm:$0xff] %v1697_v39  ;;  %v1539_v40 = vpop.f32.mrb[25].mxu0  ;;  %v1699_v41 = vpop.f32.mrb[25].mxu1 }
 0x387   : > { %v1542_v42 = vpop.f32.mrb[26].mxu0  ;;  %v1702_v43 = vpop.f32.mrb[26].mxu1 }
 0x388   : > { %1809 = vst [vmem:[#allocation8 + $0x68] sm:$0xff] %v1542_v42  ;;  %1841 = vst [vmem:[#allocation8 + $0x168] sm:$0xff] %v1702_v43  ;;  %v1544_v44 = vpop.f32.mrb[27].mxu0  ;;  %v1704_v45 = vpop.f32.mrb[27].mxu1 }
 0x38b   : > { %v1547_v46 = vpop.f32.mrb[28].mxu0  ;;  %v1707_v47 = vpop.f32.mrb[28].mxu1 }
 0x38c   : > { %1810 = vst [vmem:[#allocation8 + $0x70] sm:$0xff] %v1547_v46  ;;  %1842 = vst [vmem:[#allocation8 + $0x170] sm:$0xff] %v1707_v47  ;;  %v1549_v48 = vpop.f32.mrb[29].mxu0  ;;  %v1709_v49 = vpop.f32.mrb[29].mxu1 }
 0x38f   : > { %v1552_v50 = vpop.f32.mrb[30].mxu0  ;;  %v1712_v51 = vpop.f32.mrb[30].mxu1 }
 0x390   : > { %1811 = vst [vmem:[#allocation8 + $0x78] sm:$0xff] %v1552_v50  ;;  %1843 = vst [vmem:[#allocation8 + $0x178] sm:$0xff] %v1712_v51  ;;  %v1554_v52 = vpop.f32.mrb[31].mxu0  ;;  %v1714_v53 = vpop.f32.mrb[31].mxu1 }
 0x393   : > { %v1557_v54 = vpop.f32.mrb[32].mxu0  ;;  %v1717_v55 = vpop.f32.mrb[32].mxu1 }
 0x394   : > { %1812 = vst [vmem:[#allocation8 + $0x80] sm:$0xff] %v1557_v54  ;;  %1844 = vst [vmem:[#allocation8 + $0x180] sm:$0xff] %v1717_v55  ;;  %v1559_v56 = vpop.f32.mrb[33].mxu0  ;;  %v1719_v8 = vpop.f32.mrb[33].mxu1 }
 0x397   : > { %v1562_v57 = vpop.f32.mrb[34].mxu0  ;;  %v1722_v58 = vpop.f32.mrb[34].mxu1 }
 0x398   : > { %1813 = vst [vmem:[#allocation8 + $0x88] sm:$0xff] %v1562_v57  ;;  %1845 = vst [vmem:[#allocation8 + $0x188] sm:$0xff] %v1722_v58  ;;  %v1564_v59 = vpop.f32.mrb[35].mxu0  ;;  %v1724_v60 = vpop.f32.mrb[35].mxu1 }
 0x39b   : > { %v1567_v61 = vpop.f32.mrb[36].mxu0  ;;  %v1727_v62 = vpop.f32.mrb[36].mxu1 }
 0x39c   : > { %1814 = vst [vmem:[#allocation8 + $0x90] sm:$0xff] %v1567_v61  ;;  %1846 = vst [vmem:[#allocation8 + $0x190] sm:$0xff] %v1727_v62  ;;  %v1569_v63 = vpop.f32.mrb[37].mxu0  ;;  %v1729_v0 = vpop.f32.mrb[37].mxu1 }
 0x39f   : > { %v1572_v1 = vpop.f32.mrb[38].mxu0  ;;  %v1732_v2 = vpop.f32.mrb[38].mxu1 }
 0x3a0   : > { %1815 = vst [vmem:[#allocation8 + $0x98] sm:$0xff] %v1572_v1  ;;  %1847 = vst [vmem:[#allocation8 + $0x198] sm:$0xff] %v1732_v2  ;;  %v1574_v3 = vpop.f32.mrb[39].mxu0  ;;  %v1734_v4 = vpop.f32.mrb[39].mxu1 }
 0x3a3   : > { %v1577_v5 = vpop.f32.mrb[40].mxu0  ;;  %v1737_v6 = vpop.f32.mrb[40].mxu1 }
 0x3a4   : > { %1816 = vst [vmem:[#allocation8 + $0xa0] sm:$0xff] %v1577_v5  ;;  %1848 = vst [vmem:[#allocation8 + $0x1a0] sm:$0xff] %v1737_v6  ;;  %v1579_v7 = vpop.f32.mrb[41].mxu0  ;;  %v1739_v9 = vpop.f32.mrb[41].mxu1 }
 0x3a7   : > { %v1582_v10 = vpop.f32.mrb[42].mxu0  ;;  %v1742_v11 = vpop.f32.mrb[42].mxu1 }
 0x3a8   : > { %1817 = vst [vmem:[#allocation8 + $0xa8] sm:$0xff] %v1582_v10  ;;  %1849 = vst [vmem:[#allocation8 + $0x1a8] sm:$0xff] %v1742_v11  ;;  %v1584_v12 = vpop.f32.mrb[43].mxu0  ;;  %v1744_v13 = vpop.f32.mrb[43].mxu1 }
 0x3ab   : > { %v1587_v14 = vpop.f32.mrb[44].mxu0  ;;  %v1747_v15 = vpop.f32.mrb[44].mxu1 }
 0x3ac   : > { %1818 = vst [vmem:[#allocation8 + $0xb0] sm:$0xff] %v1587_v14  ;;  %1850 = vst [vmem:[#allocation8 + $0x1b0] sm:$0xff] %v1747_v15  ;;  %v1589_v16 = vpop.f32.mrb[45].mxu0  ;;  %v1749_v17 = vpop.f32.mrb[45].mxu1 }
 0x3af   : > { %v1592_v18 = vpop.f32.mrb[46].mxu0  ;;  %v1752_v19 = vpop.f32.mrb[46].mxu1 }
 0x3b0   : > { %1819 = vst [vmem:[#allocation8 + $0xb8] sm:$0xff] %v1592_v18  ;;  %1851 = vst [vmem:[#allocation8 + $0x1b8] sm:$0xff] %v1752_v19  ;;  %v1594_v20 = vpop.f32.mrb[47].mxu0  ;;  %v1754_v21 = vpop.f32.mrb[47].mxu1 }
 0x3b3   : > { %v1597_v22 = vpop.f32.mrb[48].mxu0  ;;  %v1757_v23 = vpop.f32.mrb[48].mxu1 }
 0x3b4   : > { %1820 = vst [vmem:[#allocation8 + $0xc0] sm:$0xff] %v1597_v22  ;;  %1852 = vst [vmem:[#allocation8 + $0x1c0] sm:$0xff] %v1757_v23  ;;  %v1599_v24 = vpop.f32.mrb[49].mxu0  ;;  %v1759_v25 = vpop.f32.mrb[49].mxu1 }
 0x3b7   : > { %v1602_v26 = vpop.f32.mrb[50].mxu0  ;;  %v1762_v27 = vpop.f32.mrb[50].mxu1 }
 0x3b8   : > { %1821 = vst [vmem:[#allocation8 + $0xc8] sm:$0xff] %v1602_v26  ;;  %1853 = vst [vmem:[#allocation8 + $0x1c8] sm:$0xff] %v1762_v27  ;;  %v1604_v28 = vpop.f32.mrb[51].mxu0  ;;  %v1764_v29 = vpop.f32.mrb[51].mxu1 }
 0x3bb   : > { %v1607_v30 = vpop.f32.mrb[52].mxu0  ;;  %v1767_v31 = vpop.f32.mrb[52].mxu1 }
 0x3bc   : > { %1822 = vst [vmem:[#allocation8 + $0xd0] sm:$0xff] %v1607_v30  ;;  %1854 = vst [vmem:[#allocation8 + $0x1d0] sm:$0xff] %v1767_v31  ;;  %v1609_v32 = vpop.f32.mrb[53].mxu0  ;;  %v1769_v33 = vpop.f32.mrb[53].mxu1 }
 0x3bf   : > { %v1612_v34 = vpop.f32.mrb[54].mxu0  ;;  %v1772_v35 = vpop.f32.mrb[54].mxu1 }
 0x3c0   : > { %1823 = vst [vmem:[#allocation8 + $0xd8] sm:$0xff] %v1612_v34  ;;  %1855 = vst [vmem:[#allocation8 + $0x1d8] sm:$0xff] %v1772_v35  ;;  %v1614_v36 = vpop.f32.mrb[55].mxu0  ;;  %v1774_v37 = vpop.f32.mrb[55].mxu1 }
 0x3c3   : > { %v1617_v38 = vpop.f32.mrb[56].mxu0  ;;  %v1777_v39 = vpop.f32.mrb[56].mxu1 }
 0x3c4   : > { %1824 = vst [vmem:[#allocation8 + $0xe0] sm:$0xff] %v1617_v38  ;;  %1856 = vst [vmem:[#allocation8 + $0x1e0] sm:$0xff] %v1777_v39  ;;  %v1619_v40 = vpop.f32.mrb[57].mxu0  ;;  %v1779_v41 = vpop.f32.mrb[57].mxu1 }
 0x3c7   : > { %v1622_v42 = vpop.f32.mrb[58].mxu0  ;;  %v1782_v43 = vpop.f32.mrb[58].mxu1 }
 0x3c8   : > { %1825 = vst [vmem:[#allocation8 + $0xe8] sm:$0xff] %v1622_v42  ;;  %1857 = vst [vmem:[#allocation8 + $0x1e8] sm:$0xff] %v1782_v43  ;;  %v1624_v44 = vpop.f32.mrb[59].mxu0  ;;  %v1784_v45 = vpop.f32.mrb[59].mxu1 }
 0x3cb   : > { %v1627_v46 = vpop.f32.mrb[60].mxu0  ;;  %v1787_v47 = vpop.f32.mrb[60].mxu1 }
 0x3cc   : > { %1826 = vst [vmem:[#allocation8 + $0xf0] sm:$0xff] %v1627_v46  ;;  %1858 = vst [vmem:[#allocation8 + $0x1f0] sm:$0xff] %v1787_v47  ;;  %v1629_v48 = vpop.f32.mrb[61].mxu0  ;;  %v1789_v49 = vpop.f32.mrb[61].mxu1 }
 0x3cf   : > { %v1632_v50 = vpop.f32.mrb[62].mxu0  ;;  %v1792_v51 = vpop.f32.mrb[62].mxu1 }
 0x3d0   : > { %1827 = vst [vmem:[#allocation8 + $0xf8] sm:$0xff] %v1632_v50  ;;  %1859 = vst [vmem:[#allocation8 + $0x1f8] sm:$0xff] %v1792_v51  ;;  %v1634_v52 = vpop.f32.mrb[63].mxu0  ;;  %v1794_v53 = vpop.f32.mrb[63].mxu1 }
 0x3d1 PF: > { %p2986_p8 = scmp.eq.s32.totalorder %s1970_s12, 1  ;;  %s2806_s15 = smov [#allocation8]  }
 0x3d2   : > { %s1875_s16 = sshll.u32 %s2806_s15, 4  ;;  %s1876_s16 = int_to_ptr.vmem [resolvable:$true] %s1875_s16 }
 0x3d3   : > { %s2735_s28 = scalar_lea.vmem %s1876_s16, 8192  ;;  %s2741_s29 = scalar_lea.vmem %s1876_s16, 16384 }
 0x3d4   : > { %p2736_p9 = scmp.ne.s32.totalorder %s1876_s16, %s2735_s28  ;;  %p2742_p1 = scmp.lt.s32.totalorder %s1876_s16, %s1876_s16 }
 0x3d5   : > { %p2743_p2 = scmp.lt.s32.totalorder %s2741_s29, %s2735_s28 }
 0x3d6   : > { %p2737_p13 = pnand %p2736_p9, %p2986_p8 }
 0x3d7   : > { %p2744_p5 = por %p2743_p2, %p2742_p1 }
 0x3d8   : > { %p2738_p0 = pneg %p2737_p13 }
 0x3da   : > { %p2745_p10 = pnand %p2744_p5, %p2738_p0 }
 0x3dc   : > { %2748 = shalt.err (!%p2745_p10)
}
 0x3dd   : > { %s2749_s3 = scalar_lea.hbm %s3023_s2, 8192 }
 0x3de   : > { %p2750_p11 = scmp.ne.s32.totalorder %s3023_s2, %s2749_s3  ;;  %p2755_p6 = scmp.lt.u32.totalorder %s2749_s3, %s3023_s2 }
 0x3e0   : > { %p2751_p3 = pnand %p2750_p11, %p2986_p8 }
 0x3e2   : > { %p2752_p4 = pneg %p2751_p3 }
 0x3e4   : > { %p2757_p12 = pnand %p2755_p6, %p2752_p4 }
 0x3e6   : > { %2760 = shalt.err (!%p2757_p12)
}
 0x3e7   : > { %s2807_s8 = smov 128   ;;  %s2808_s17 = smov 8  }
 0x3e8   : > { %2172 = dma.vmem_to_hbm [thread:$0]  (%p2986_p8), %s1876_s16, 8192, %s3023_s2, [#allocation5], %s2807_s8, %s2807_s8, %s2808_s17  }
 0x3e9 PF: > { %p2194_p7 = scmp.eq.s32.totalorder %s1971_s13, 1  ;;  %p3036_p9 = scmp.ge.s32.totalorder %s2795_s11, 2 }
 0x3eb   : > { %p2184_p13 = pnand %p2194_p7, %p3036_p9 }
 0x3ed   : > { %2782 = dma.done.wait (!%p2184_p13), [#allocation5], 8192  }
 0x3ee   : > { %2784 = vsyncadd (!%p2184_p13), [#allocation5], 4294959104  ;;  %s19_s11 = sadd.s32 1, %s2795_s11   ;;  %s3037_s9 = smov %s2791_s10 }
 0x3ef   : > { %p16_p0 = scmp.ge.s32.totalorder %s19_s11, 4   ;;  %s3038_s10 = smov %s3040_s14 }
 0x3f1   :  { %18 = sbr.rel (!%p16_p0) target bundleno = 6 (0x6), region = 91 }
 0x3f8   :  { %1896 = vsyncpa [#allocation4], 1 }
 0x3f9   :  { %1898 = vsyncpa [#allocation4 + $0x1], 1 }
 0x3fa   :  { %1899 = vsyncpa [#allocation7], 1 }
 0x3fb   :  { %1901 = vsyncpa [#allocation7 + $0x1], 1 }
 0x3fc   :  { %1902 = vsyncpa [#allocation5], 1 }
 0x3fd   :  { %1904 = vsyncpa [#allocation5 + $0x1], 1 }

</bundles_post_ra>
